<compile_context>
chip_gen: v7x
topology: tpu7x:2x2x1
jax: 0.10.0
libtpu: 0.0.40
codegen_flags: <defaults>
</compile_context>

<pallas_src>
import jax
import jax.numpy as jnp
from jax import lax
from jax.experimental import pallas as pl
from jax.experimental.pallas import tpu as pltpu


def self_attention_2d_kernel(x_ref, wq_ref, bq_ref, wk_ref, bk_ref,
                             wv_ref, bv_ref, gamma_ref, o_ref):
    # x_ref: (1, C, HW) block for one batch element.
    x = x_ref[0].astype(jnp.float32)                       # (C, HW)

    wq = wq_ref[...].astype(jnp.float32)                   # (Cq, C)
    wk = wk_ref[...].astype(jnp.float32)                   # (Cq, C)
    wv = wv_ref[...].astype(jnp.float32)                   # (C,  C)

    # 1x1 convs == channel-mixing matmuls over the (C, HW) slab (+ bias).
    q = jnp.dot(wq, x, preferred_element_type=jnp.float32) + bq_ref[...]  # (Cq, HW)
    k = jnp.dot(wk, x, preferred_element_type=jnp.float32) + bk_ref[...]  # (Cq, HW)
    v = jnp.dot(wv, x, preferred_element_type=jnp.float32) + bv_ref[...]  # (C,  HW)

    # scores[i, j] = q[:, i] . k[:, j]  (contract channel dim of both -> MXU)
    scores = lax.dot_general(q, k, (((0,), (0,)), ((), ())),
                             preferred_element_type=jnp.float32)          # (HW, HW)

    # Row softmax over j (last / lane axis), numerically stable.
    m = jnp.max(scores, axis=-1, keepdims=True)
    e = jnp.exp(scores - m)
    denom = jnp.sum(e, axis=-1, keepdims=True)
    attn = e / denom                                                      # (HW, HW)

    # out[c, i] = sum_j v[c, j] * attn[i, j]   (trans_b contraction on MXU)
    out = lax.dot_general(v, attn, (((1,), (1,)), ((), ())),
                          preferred_element_type=jnp.float32)             # (C, HW)

    gamma = gamma_ref[...]                                                # (1, 1)
    o_ref[0] = (gamma * out + x).astype(o_ref.dtype)


def self_attention_2d(x, wq, bq, wk, bk, wv, bv, gamma):
    """x: (B, C, H, W) NCHW. wq/wk: (C//8, C), wv: (C, C), biases 1-D, gamma scalar."""
    B, C, H, W = x.shape
    HW = H * W
    Cq = wq.shape[0]

    x_flat = x.reshape(B, C, HW)                  # free view: channels x spatial
    bq2 = bq.reshape(Cq, 1).astype(jnp.float32)   # broadcast over HW inside kernel
    bk2 = bk.reshape(Cq, 1).astype(jnp.float32)
    bv2 = bv.reshape(C, 1).astype(jnp.float32)
    gamma2 = jnp.asarray(gamma, jnp.float32).reshape(1, 1)

    out_flat = pl.pallas_call(
        self_attention_2d_kernel,
        out_shape=jax.ShapeDtypeStruct((B, C, HW), x.dtype),
        grid_spec=pltpu.PrefetchScalarGridSpec(
            num_scalar_prefetch=0,
            grid=(B,),
            in_specs=[
                pl.BlockSpec((1, C, HW), lambda b: (b, 0, 0)),   # x
                pl.BlockSpec((Cq, C), lambda b: (0, 0)),         # wq
                pl.BlockSpec((Cq, 1), lambda b: (0, 0)),         # bq
                pl.BlockSpec((Cq, C), lambda b: (0, 0)),         # wk
                pl.BlockSpec((Cq, 1), lambda b: (0, 0)),         # bk
                pl.BlockSpec((C, C), lambda b: (0, 0)),          # wv
                pl.BlockSpec((C, 1), lambda b: (0, 0)),          # bv
                pl.BlockSpec((1, 1), lambda b: (0, 0)),          # gamma
            ],
            out_specs=pl.BlockSpec((1, C, HW), lambda b: (b, 0, 0)),
        ),
        compiler_params=pltpu.CompilerParams(
            dimension_semantics=("parallel",)),
    )(x_flat, wq, bq2, wk, bk2, wv, bv2, gamma2)

    return out_flat.reshape(B, C, H, W)


def self_attention_2d_ref(x, wq, bq, wk, bk, wv, bv, gamma):
    """Pure-JAX reference mirroring the PyTorch forward."""
    B, C, H, W = x.shape
    HW = H * W
    xf = x.reshape(B, C, HW)
    q = jnp.einsum('rc,bci->bri', wq, xf) + bq[None, :, None]   # (B, Cq, HW)
    k = jnp.einsum('rc,bci->bri', wk, xf) + bk[None, :, None]   # (B, Cq, HW)
    v = jnp.einsum('oc,bci->boi', wv, xf) + bv[None, :, None]   # (B, C,  HW)
    scores = jnp.einsum('bri,brj->bij', q, k)                   # (B, HW, HW)
    attn = jax.nn.softmax(scores, axis=-1)
    out = jnp.einsum('bcj,bij->bci', v, attn)                   # (B, C, HW)
    y = gamma * out + xf
    return y.reshape(B, C, H, W)


if __name__ == "__main__":
    # Small shapes consistent with the module: in_dim=32 -> C//8 = 4, 16x16 spatial.
    B, C, H, W = 2, 32, 16, 16
    Cq = C // 8

    key = jax.random.PRNGKey(0)
    kx, k1, k2, k3, k4, k5, k6 = jax.random.split(key, 7)

    x = jax.random.normal(kx, (B, C, H, W), dtype=jnp.float32)
    wq = jax.random.normal(k1, (Cq, C), dtype=jnp.float32) * (1.0 / jnp.sqrt(C))
    bq = jax.random.normal(k2, (Cq,), dtype=jnp.float32) * 0.1
    wk = jax.random.normal(k3, (Cq, C), dtype=jnp.float32) * (1.0 / jnp.sqrt(C))
    bk = jax.random.normal(k4, (Cq,), dtype=jnp.float32) * 0.1
    wv = jax.random.normal(k5, (C, C), dtype=jnp.float32) * (1.0 / jnp.sqrt(C))
    bv = jax.random.normal(k6, (C,), dtype=jnp.float32) * 0.1
    # The module initializes gamma to 0 (output == x); use a nonzero value so
    # the attention path is actually exercised by the check.
    gamma = jnp.float32(0.5)

    y = self_attention_2d(x, wq, bq, wk, bk, wv, bv, gamma)
    y = jax.block_until_ready(y)

    y_ref = self_attention_2d_ref(x, wq, bq, wk, bk, wv, bv, gamma)
    assert y.shape == (B, C, H, W)
    assert jnp.allclose(y, y_ref, atol=1e-3, rtol=1e-3), "mismatch vs reference"

    print("KERNEL_OK")
</pallas_src>

<mosaic_0001>
module attributes {stable_mosaic.version = 11 : i64} {
  func.func @self_attention_2d_kernel(%arg0: i32, %arg1: memref<1x32x256xf32, #tpu.memory_space<vmem>>, %arg2: memref<4x32xf32, #tpu.memory_space<vmem>>, %arg3: memref<4x1xf32, #tpu.memory_space<vmem>>, %arg4: memref<4x32xf32, #tpu.memory_space<vmem>>, %arg5: memref<4x1xf32, #tpu.memory_space<vmem>>, %arg6: memref<32x32xf32, #tpu.memory_space<vmem>>, %arg7: memref<32x1xf32, #tpu.memory_space<vmem>>, %arg8: memref<1x1xf32, #tpu.memory_space<vmem>>, %arg9: memref<1x32x256xf32, #tpu.memory_space<vmem>>) attributes {dimension_semantics = [#tpu.dimension_semantics<parallel>], iteration_bounds = array<i64: 2>, scalar_prefetch = 0 : i64, scratch_operands = 0 : i64, tpu.core_type = #tpu.core_type<tc>, window_params = [{transform_indices = @transform_0, window_bounds = array<i64: 1, 32, 256>}, {pipeline_mode = #tpu.pipeline_mode<synchronous>, transform_indices = @transform_1, window_bounds = array<i64: 4, 32>}, {pipeline_mode = #tpu.pipeline_mode<synchronous>, transform_indices = @transform_2, window_bounds = array<i64: 4, 1>}, {pipeline_mode = #tpu.pipeline_mode<synchronous>, transform_indices = @transform_3, window_bounds = array<i64: 4, 32>}, {pipeline_mode = #tpu.pipeline_mode<synchronous>, transform_indices = @transform_4, window_bounds = array<i64: 4, 1>}, {pipeline_mode = #tpu.pipeline_mode<synchronous>, transform_indices = @transform_5, window_bounds = array<i64: 32, 32>}, {pipeline_mode = #tpu.pipeline_mode<synchronous>, transform_indices = @transform_6, window_bounds = array<i64: 32, 1>}, {pipeline_mode = #tpu.pipeline_mode<synchronous>, transform_indices = @transform_7, window_bounds = array<i64: 1, 1>}, {transform_indices = @transform_8, window_bounds = array<i64: 1, 32, 256>}]} {
    %c0 = arith.constant 0 : index
    %c0_0 = arith.constant 0 : index
    %c0_1 = arith.constant 0 : index
    %0 = vector.load %arg1[%c0, %c0_0, %c0_1] : memref<1x32x256xf32, #tpu.memory_space<vmem>>, vector<1x32x256xf32>
    %1 = vector.shape_cast %0 : vector<1x32x256xf32> to vector<32x256xf32>
    %c0_2 = arith.constant 0 : index
    %c0_3 = arith.constant 0 : index
    %2 = vector.load %arg2[%c0_2, %c0_3] : memref<4x32xf32, #tpu.memory_space<vmem>>, vector<4x32xf32>
    %c0_4 = arith.constant 0 : index
    %c0_5 = arith.constant 0 : index
    %3 = vector.load %arg4[%c0_4, %c0_5] : memref<4x32xf32, #tpu.memory_space<vmem>>, vector<4x32xf32>
    %c0_6 = arith.constant 0 : index
    %c0_7 = arith.constant 0 : index
    %4 = vector.load %arg6[%c0_6, %c0_7] : memref<32x32xf32, #tpu.memory_space<vmem>>, vector<32x32xf32>
    %cst = arith.constant dense<0.000000e+00> : vector<4x256xf32>
    %5 = tpu.matmul %2, %1, %cst {dimension_numbers = #tpu.dot_dimension_numbers<[1], [0], [0], [1], [0, 0, 1, 1], [], []>} : vector<4x32xf32>, vector<32x256xf32>, vector<4x256xf32> -> vector<4x256xf32>
    %c0_8 = arith.constant 0 : index
    %c0_9 = arith.constant 0 : index
    %6 = vector.load %arg3[%c0_8, %c0_9] : memref<4x1xf32, #tpu.memory_space<vmem>>, vector<4x1xf32>
    %7 = vector.broadcast %6 : vector<4x1xf32> to vector<4x256xf32>
    %8 = arith.addf %5, %7 : vector<4x256xf32>
    %cst_10 = arith.constant dense<0.000000e+00> : vector<4x256xf32>
    %9 = tpu.matmul %3, %1, %cst_10 {dimension_numbers = #tpu.dot_dimension_numbers<[1], [0], [0], [1], [0, 0, 1, 1], [], []>} : vector<4x32xf32>, vector<32x256xf32>, vector<4x256xf32> -> vector<4x256xf32>
    %c0_11 = arith.constant 0 : index
    %c0_12 = arith.constant 0 : index
    %10 = vector.load %arg5[%c0_11, %c0_12] : memref<4x1xf32, #tpu.memory_space<vmem>>, vector<4x1xf32>
    %11 = vector.broadcast %10 : vector<4x1xf32> to vector<4x256xf32>
    %12 = arith.addf %9, %11 : vector<4x256xf32>
    %cst_13 = arith.constant dense<0.000000e+00> : vector<32x256xf32>
    %13 = tpu.matmul %4, %1, %cst_13 {dimension_numbers = #tpu.dot_dimension_numbers<[1], [0], [0], [1], [0, 0, 1, 1], [], []>} : vector<32x32xf32>, vector<32x256xf32>, vector<32x256xf32> -> vector<32x256xf32>
    %c0_14 = arith.constant 0 : index
    %c0_15 = arith.constant 0 : index
    %14 = vector.load %arg7[%c0_14, %c0_15] : memref<32x1xf32, #tpu.memory_space<vmem>>, vector<32x1xf32>
    %15 = vector.broadcast %14 : vector<32x1xf32> to vector<32x256xf32>
    %16 = arith.addf %13, %15 : vector<32x256xf32>
    %cst_16 = arith.constant dense<0.000000e+00> : vector<256x256xf32>
    %17 = tpu.matmul %8, %12, %cst_16 {dimension_numbers = #tpu.dot_dimension_numbers<[0], [0], [1], [1], [0, 1, 1, 1], [], []>} : vector<4x256xf32>, vector<4x256xf32>, vector<256x256xf32> -> vector<256x256xf32>
    %cst_17 = arith.constant dense<0xFF800000> : vector<256xf32>
    %18 = vector.multi_reduction <maximumf>, %17, %cst_17 [1] : vector<256x256xf32> to vector<256xf32>
    %19 = vector.shape_cast %18 : vector<256xf32> to vector<256x1xf32>
    %20 = vector.broadcast %19 : vector<256x1xf32> to vector<256x256xf32>
    %21 = arith.subf %17, %20 : vector<256x256xf32>
    %22 = math.exp %21 : vector<256x256xf32>
    %cst_18 = arith.constant dense<0.000000e+00> : vector<256xf32>
    %23 = vector.multi_reduction <add>, %22, %cst_18 [1] : vector<256x256xf32> to vector<256xf32>
    %24 = vector.shape_cast %23 : vector<256xf32> to vector<256x1xf32>
    %25 = vector.broadcast %24 : vector<256x1xf32> to vector<256x256xf32>
    %26 = arith.divf %22, %25 : vector<256x256xf32>
    %cst_19 = arith.constant dense<0.000000e+00> : vector<32x256xf32>
    %27 = tpu.matmul %16, %26, %cst_19 {dimension_numbers = #tpu.dot_dimension_numbers<[1], [1], [0], [0], [0, 0, 1, 0], [], []>} : vector<32x256xf32>, vector<256x256xf32>, vector<32x256xf32> -> vector<32x256xf32>
    %c0_20 = arith.constant 0 : index
    %c0_21 = arith.constant 0 : index
    %28 = vector.load %arg8[%c0_20, %c0_21] : memref<1x1xf32, #tpu.memory_space<vmem>>, vector<1x1xf32>
    %29 = vector.broadcast %28 : vector<1x1xf32> to vector<32x256xf32>
    %30 = arith.mulf %29, %27 : vector<32x256xf32>
    %31 = arith.addf %30, %1 : vector<32x256xf32>
    %c0_22 = arith.constant 0 : index
    %c0_23 = arith.constant 0 : index
    %c0_24 = arith.constant 0 : index
    %32 = vector.load %arg9[%c0_22, %c0_23, %c0_24] : memref<1x32x256xf32, #tpu.memory_space<vmem>>, vector<1x32x256xf32>
    %33 = vector.shape_cast %32 : vector<1x32x256xf32> to vector<32x256xf32>
    %34 = vector.shape_cast %31 : vector<32x256xf32> to vector<1x32x256xf32>
    tpu.vector_store %arg9[%c0_22, %c0_23, %c0_24], %34 {strides = array<i32>} : memref<1x32x256xf32, #tpu.memory_space<vmem>>, vector<1x32x256xf32>,
    return
  }
  func.func @transform_0(%arg0: i32) -> (i32, i32, i32) {
    %c0_i32 = arith.constant 0 : i32
    %c0_i32_0 = arith.constant 0 : i32
    %c0_i32_1 = arith.constant 0 : i32
    return %arg0, %c0_i32, %c0_i32_0 : i32, i32, i32
  }
  func.func @transform_1(%arg0: i32) -> (i32, i32) {
    %c0_i32 = arith.constant 0 : i32
    %c0_i32_0 = arith.constant 0 : i32
    %c0_i32_1 = arith.constant 0 : i32
    return %c0_i32, %c0_i32_0 : i32, i32
  }
  func.func @transform_2(%arg0: i32) -> (i32, i32) {
    %c0_i32 = arith.constant 0 : i32
    %c0_i32_0 = arith.constant 0 : i32
    %c0_i32_1 = arith.constant 0 : i32
    return %c0_i32, %c0_i32_0 : i32, i32
  }
  func.func @transform_3(%arg0: i32) -> (i32, i32) {
    %c0_i32 = arith.constant 0 : i32
    %c0_i32_0 = arith.constant 0 : i32
    %c0_i32_1 = arith.constant 0 : i32
    return %c0_i32, %c0_i32_0 : i32, i32
  }
  func.func @transform_4(%arg0: i32) -> (i32, i32) {
    %c0_i32 = arith.constant 0 : i32
    %c0_i32_0 = arith.constant 0 : i32
    %c0_i32_1 = arith.constant 0 : i32
    return %c0_i32, %c0_i32_0 : i32, i32
  }
  func.func @transform_5(%arg0: i32) -> (i32, i32) {
    %c0_i32 = arith.constant 0 : i32
    %c0_i32_0 = arith.constant 0 : i32
    %c0_i32_1 = arith.constant 0 : i32
    return %c0_i32, %c0_i32_0 : i32, i32
  }
  func.func @transform_6(%arg0: i32) -> (i32, i32) {
    %c0_i32 = arith.constant 0 : i32
    %c0_i32_0 = arith.constant 0 : i32
    %c0_i32_1 = arith.constant 0 : i32
    return %c0_i32, %c0_i32_0 : i32, i32
  }
  func.func @transform_7(%arg0: i32) -> (i32, i32) {
    %c0_i32 = arith.constant 0 : i32
    %c0_i32_0 = arith.constant 0 : i32
    %c0_i32_1 = arith.constant 0 : i32
    return %c0_i32, %c0_i32_0 : i32, i32
  }
  func.func @transform_8(%arg0: i32) -> (i32, i32, i32) {
    %c0_i32 = arith.constant 0 : i32
    %c0_i32_0 = arith.constant 0 : i32
    %c0_i32_1 = arith.constant 0 : i32
    return %arg0, %c0_i32, %c0_i32_0 : i32, i32, i32
  }
}

</mosaic_0001>

<bundles_post_ra>
// kernel: tpu_custom_call.1
= control target key start
LH: loop header
LB: loop body
LE: loop exit
PB: predicated region body
PF: predicated region fallthrough
CT: control target
= control target key end

     0   :  { %s3143_s0 = inlined_call_operand.hbm [shape: f32[2,32,256], index: 0, kind: input, shape index: {}]   ;;  %s3144_s1 = inlined_call_operand.vmem [shape: f32[4,32], index: 1, kind: input, shape index: {}]   ;;  %s3145_s2 = inlined_call_operand.vmem [shape: f32[4,1], index: 2, kind: input, shape index: {}]   ;;  %s3146_s3 = inlined_call_operand.vmem [shape: f32[4,32], index: 3, kind: input, shape index: {}]   ;;  %s3147_s4 = inlined_call_operand.vmem [shape: f32[4,1], index: 4, kind: input, shape index: {}]   ;;  %s3148_s5 = inlined_call_operand.vmem [shape: f32[32,32], index: 5, kind: input, shape index: {}]   ;;  %s3149_s6 = inlined_call_operand.vmem [shape: f32[32,1], index: 6, kind: input, shape index: {}]   ;;  %s3150_s7 = inlined_call_operand.<no memory space> [shape: f32[1,1], index: 7, kind: input, shape index: {}]   ;;  %s3151_s8 = inlined_call_operand.hbm [shape: f32[2,32,256], index: 8, kind: output, shape index: {}]  }
   0x1   :  { %v13_v0 = vstv %s3150_s7 }
   0x2   :  { %14 = vst [vmem:[#allocation2] sm:$0x1] %v13_v0 }
   0x3   :  { %15 = vsyncpa [#allocation4], 0 }
   0x4   :  { %17 = vsyncpa [#allocation4 + $0x1], 0 }
   0x5   :  { %18 = vsyncpa [#allocation5], 0 }
   0x6   :  { %20 = vsyncpa [#allocation5 + $0x1], 0  ;;  %s2294_s29 = smov 0   ;;  %s2296_s30 = smov 0  }
   0x7   :  { %s2298_s9 = smov 0   ;;  %s2300_s10 = smov 0  }
   0x8 LB: > { %s2315_s7 = sadd.s32 4294967295, %s2236_s10   ;;  %s1741_s11 = sadd.s32 4294967294, %s2236_s10   ;;  %s2236_s10 = sphi %s2300_s10, %s3249_s10   ;;  %s2232_s9 = sphi %s2298_s9, %s3248_s9   ;;  %s2228_s30 = sphi %s2296_s30, %s3247_s30   ;;  %s2224_s29 = sphi %s2294_s29, %s3246_s29  }
   0x9   : > { %s2319_s12 = sadd.s32 1, %s2236_s10   ;;  %s33_s13 = sadd.s32 1, %s2232_s9 }
   0xa   : > { %s30_s14 = ssub.s32 %s2236_s10, %s2319_s12  ;;  %p40_p0 = scmp.ne.s32.totalorder %s2232_s9, %s2228_s30 }
   0xb   : > { %p31_p1 = scmp.eq.s32.totalorder %s30_s14, 0  ;;  %p41_p2 = scmp.eq.s32.totalorder %s2236_s10, 0 }
   0xc   : > { %p46_p3 = scmp.ne.s32.totalorder %s2228_s30, %s2224_s29  ;;  %p47_p4 = scmp.eq.s32.totalorder %s2315_s7, 0 }
   0xd   : > { %s2331_s15 = scalar_select %p31_p1, %s2232_s9, %s33_s13  }
   0xe   : > { %p2333_p5 = por %p41_p2, %p40_p0  ;;  %p2337_p6 = por %p47_p4, %p46_p3 }
   0xf   : > { %p217_p7 = scmp.eq.s32.totalorder %s2315_s7, 1  ;;  %p223_p8 = scmp.eq.s32.totalorder %s1741_s11, 1 }
  0x10   : > { %p1898_p10 = scmp.lt.s32.totalorder %s2236_s10, 2  ;;  %s264_s20 = sand.u32 1, %s2232_s9  }
  0x11   : > { %p2344_p11 = por %p217_p7, %p40_p0  ;;  %p2348_p12 = por %p223_p8, %p46_p3 }
  0x12   : > { %s1796_s21 = sshll.u32 %s2236_s10, 10  ;;  %s1744_s22 = sshll.u32 %s264_s20, 6 }
  0x13   : > { %s3183_s18 = scalar_select %p2344_p11, 1, 0 }
  0x14   : > { %s3184_s19 = scalar_select %p2348_p12, 1, 0 }
  0x15   : > { %s2357_s25 = scalar_lea.hbm %s3143_s0, %s1796_s21  ;;  %s268_s26 = scalar_lea.vmem [#allocation3], %s1744_s22 }
  0x16   : > { %s275_s27 = sshll.u32 %s268_s26, 4  ;;  %p2361_p13 = pnand %p1898_p10, %p2333_p5  ;;  %s2365_s27 = int_to_ptr.vmem [resolvable:$true] %s275_s27 }
  0x17   : > { %s2367_s11 = scalar_lea.sflag [#allocation4], %s264_s20  ;;  %s2140_s13 = scalar_lea.hbm %s2357_s25, 1024 }
  0x18   : > { %p2141_p0 = scmp.ne.s32.totalorder %s2357_s25, %s2140_s13  ;;  %p2142_p1 = pneg %p2361_p13 }
  0x19   : > { %s2145_s21 = scalar_lea.hbm %s3143_s0, 2048  ;;  %p2146_p4 = scmp.lt.u32.totalorder %s2357_s25, %s3143_s0 }
  0x1a   : > { %p2143_p2 = pnand %p2142_p1, %p2141_p0  ;;  %p2147_p5 = scmp.lt.u32.totalorder %s2145_s21, %s2140_s13 }
  0x1b   : > { %p2149_p8 = scmp.lt.u32.totalorder %s2140_s13, %s2357_s25 }
  0x1c   : > { %p2144_p3 = pneg %p2143_p2  ;;  %p2148_p7 = por %p2147_p5, %p2146_p4 }
  0x1e   : > { %p2150_p10 = por %p2149_p8, %p2148_p7 }
  0x20   : > { %p2151_p9 = pnand %p2150_p10, %p2144_p3 }
  0x22   : > { %2154 = shalt.err (!%p2151_p9)
}
  0x23   : > { %s2155_s20 = scalar_lea.vmem %s2365_s27, 1024  ;;  %s2238_s24 = smov [#allocation3]  }
  0x24   : > { %p2156_p0 = scmp.ne.s32.totalorder %s2365_s27, %s2155_s20  ;;  %s2160_s26 = sshll.u32 %s2238_s24, 4  ;;  %s2161_s26 = int_to_ptr.vmem [resolvable:$false] %s2160_s26 }
  0x25   : > { %s2162_s14 = scalar_lea.vmem %s2161_s26, 2048  ;;  %p2163_p11 = scmp.lt.s32.totalorder %s2365_s27, %s2161_s26 }
  0x26   : > { %p2158_p2 = pnand %p2156_p0, %p2142_p1  ;;  %p2164_p4 = scmp.lt.s32.totalorder %s2162_s14, %s2155_s20 }
  0x28   : > { %p2159_p12 = pneg %p2158_p2  ;;  %p2165_p5 = por %p2164_p4, %p2163_p11 }
  0x2a   : > { %p2166_p7 = pnand %p2165_p5, %p2159_p12 }
  0x2c   : > { %2169 = shalt.err (!%p2166_p7)
}
  0x2d   : > { %s2239_s13 = smov 256   ;;  %s2240_s16 = smov 16  }
  0x2e   : > { %1893 = dma.hbm_to_vmem [thread:$0]  (!%p2361_p13), %s2357_s25, 1024, %s2365_s27, %s2367_s11, %s2239_s13, %s2239_s13, %s2240_s16  }
  0x2f   : > { %p1747_p9 = scmp.ge.s32.totalorder %s2236_s10, 1  ;;  %p283_p1 = scmp.lt.s32.totalorder %s2236_s10, 3 }
  0x31   : > { %p284_p3 = pnand %p1747_p9, %p283_p1 }
  0x33   : > { %287 = sbr.rel (%p284_p3) target bundleno = 1392 (0x570), region = 52 }
  0x3a   : > { %s2398_s21 = sand.u32 1, %s2228_s30  }
  0x3b   : > { %s1748_s22 = sshll.u32 %s2398_s21, 6  ;;  %s290_s23 = scalar_lea.sflag [#allocation4], %s2398_s21 }
  0x3c   : > { %s2404_s20 = scalar_lea.vmem [#allocation3], %s1748_s22 }
  0x3d   : > { %2215 = dma.done.wait (%p2337_p6), %s290_s23, 1024  }
  0x3e   : > { %2217 = vsyncadd (%p2337_p6), %s290_s23, 4294966272  ;;  %v3153_v1 = vmov 0.0   ;;  %v2242_v2 = vmov 0   ;;  %v327_v3 = vld [vmem:[%s2404_s20 + $0x8] sm:$0xff]  ;;  %v329_v4 = vld [vmem:[%s2404_s20 + $0x18] sm:$0xff]  ;;  %vm346_vm0 = vcmask 261120  }
  0x3f   : > { %414 = vmatprep.mubr.f32.mxu0 %v3153_v1  ;;  %1938 = vset.pattern.permute.xlu0 %v2242_v2  ;;  %v326_v5 = vld [vmem:[%s2404_s20] sm:$0xff]  ;;  %v1798_v6 = vpack.c.bf16 %v329_v4, %v327_v3  ;;  %v328_v7 = vld [vmem:[%s2404_s20 + $0x10] sm:$0xff]  ;;  %v331_v8 = vld [vmem:[%s2404_s20 + $0x28] sm:$0xff]  ;;  %vm787_vm1 = vcmask 1043456   ;;  %vm690_vm2 = vcmask 31744   ;;  %s3076_s27 = scalar_lea.vmem [#allocation6], %s1748_s22 }
  0x40   : > { %858 = vmatprep.mubr.f32.mxu1 %v3153_v1  ;;  %v333_v9 = vld [vmem:[%s2404_s20 + $0x38] sm:$0xff]  ;;  %v1800_v10 = vpack.c.bf16 %v328_v7, %v326_v5  ;;  %v330_v12 = vld [vmem:[%s2404_s20 + $0x20] sm:$0xff]  ;;  %v332_v13 = vld [vmem:[%s2404_s20 + $0x30] sm:$0xff]  ;;  %s1668_s22 = sshll.u32 %s3076_s27, 4  ;;  %s1797_s28 = sshll.u32 %s2315_s7, 10  ;;  %s3089_s22 = int_to_ptr.vmem [resolvable:$true] %s1668_s22 }
  0x41   : > { %v1802_v11 = vpack.c.bf16 %v333_v9, %v331_v8  ;;  %1799 = vmatprep.subr.bf16.mxu0 %v1798_v6  ;;  %v340_v14 = vld [vmem:[%s3145_s2] sm:$0xf]  ;;  %v1804_v15 = vpack.c.bf16 %v332_v13, %v330_v12  ;;  %s3096_s26 = scalar_lea.hbm %s3151_s8, %s1797_s28  ;;  %s1655_s7 = scalar_lea.sflag [#allocation5], %s2398_s21 }
  0x42   : > { %1801 = vmatpush1.bf16.msra.mxu0 %v1800_v10  ;;  %343 = vperm.xlu0 %1938, %v340_v14   ;;  %v421_v16 = vld [vmem:[%s3147_s4] sm:$0xf]  ;;  %s2170_s14 = scalar_lea.vmem %s3089_s22, 1024  ;;  %p3243_p11 = scmp.ne.s32.totalorder %s3183_s18, 0 }
  0x43   : > { %1803 = vmatprep.subr.bf16.mxu0 %v1802_v11  ;;  %v334_v17 = vld [vmem:[%s3144_s1] sm:$0xf]  ;;  %p2171_p6 = scmp.ne.s32.totalorder %s3089_s22, %s2170_s14  ;;  %s2243_s13 = smov [#allocation6]  }
  0x44   : > { %v335_v18 = vld [vmem:[%s3146_s3] sm:$0xf]  ;;  %s2174_s16 = sshll.u32 %s2243_s13, 4  ;;  %s2175_s16 = int_to_ptr.vmem [resolvable:$false] %s2174_s16 }
  0x45   : > { %p2172_p12 = pnand %p2171_p6, %p3243_p11  ;;  %s2176_s23 = scalar_lea.vmem %s2175_s16, 2048 }
  0x46   : > { %1805 = vmatpush1.bf16.msra.mxu0 %v1804_v15  ;;  %424 = vperm.xlu0 %1938, %v421_v16   ;;  %p2177_p8 = scmp.lt.s32.totalorder %s3089_s22, %s2175_s16  ;;  %p2178_p10 = scmp.lt.s32.totalorder %s2176_s23, %s2170_s14 }
  0x47   : > { %1807 = vmatprep.subr.bf16.mxu0 %v1798_v6  ;;  %p2173_p13 = pneg %p2172_p12 }
  0x48   : > { %p2179_p0 = por %p2178_p10, %p2177_p8 }
  0x49   : > { %1750 = vmatmul.mubr.msk.f32.vlgmr.msra.gmra.mrb[0].mxu0 %vm346_vm0, %v334_v17 }
  0x4a   : > { %1809 = vmatpush1.bf16.msra.mxu0 %v1800_v10  ;;  %494 = vmatprep.mubr.f32.mxu0 %v3153_v1  ;;  %p2180_p2 = pnand %p2179_p0, %p2173_p13 }
  0x4b   : > { %1811 = vmatprep.subr.bf16.mxu0 %v1802_v11 }
  0x4e   : > { %1813 = vmatpush1.bf16.msra.mxu0 %v1804_v15 }
  0x4f   : > { %1815 = vmatprep.subr.bf16.mxu0 %v1798_v6 }
  0x51   : > { %1751 = vmatmul.mubr.msk.f32.vlgmr.msra.gmra.mrb[2].mxu0 %vm346_vm0, %v335_v18 }
  0x52   : > { %1817 = vmatpush1.bf16.msra.mxu0 %v1800_v10  ;;  %601 = vmatprep.mubr.f32.mxu0 %v3153_v1 }
  0x53   : > { %1819 = vmatprep.subr.bf16.mxu0 %v1802_v11 }
  0x56   : > { %1821 = vmatpush1.bf16.msra.mxu0 %v1804_v15 }
  0xc1   : > { %v344_v19 = vpop.permute.xlu0 %343 }
  0xc5   : > { %v425_v24 = vpop.permute.xlu0 %424 }
 0x11c   : > { %v416_v20 = vpop.f32.mrb[0].mxu0 }
 0x11d   : > { %v418_v21 = vpop.f32.mrb[1].mxu0  ;;  %v417_v22 = vadd.f32 %v416_v20, %v344_v19 }
 0x11e   : > { %v419_v28 = vadd.f32 %v418_v21, %v344_v19 }
 0x11f   : > { %626 = vxpose.xlu1.b32.start.end [1/1] (short) %v417_v22, 128 }
 0x124   : > { %v496_v23 = vpop.f32.mrb[2].mxu0 }
 0x125   : > { %v498_v25 = vpop.f32.mrb[3].mxu0  ;;  %v497_v27 = vadd.f32 %v496_v23, %v425_v24 }
 0x126   : > { %v499_v26 = vadd.f32 %v498_v25, %v425_v24 }
 0x128   : > { %1756 = vmatprep.subr.msk.mxu1 %vm787_vm1, %v499_v26 }
 0x129   : > { %1757 = vmatpush1.msk.msra.mxu1 %vm787_vm1, %v497_v27 }
 0x15c   : > { %658 = vxpose.xlu1.b32.start.end [1/1] (short) %v419_v28, 128 }
 0x17a   : > { %1939 = vset.pattern.permute.xlu1 %v2242_v2 }
 0x19f   : > { %v642_v29 = vpop.trf.xlu1 }
 0x1a0   : > { %1758 = vmatmul.mubr.msk.f32.vlgmr.msra.gmra.mrb[0].mxu1 %vm690_vm2, %v642_v29 }
 0x1a1   : > { %864 = vmatprep.mubr.f32.mxu1 %v3153_v1 }
 0x1a3   : > { %v643_v30 = vpop.trf.xlu1 }
 0x1a4   : > { %1759 = vmatmul.mubr.msk.f32.gmra.mrb[2].mxu1 %vm690_vm2, %v643_v30 }
 0x1a5   : > { %870 = vmatprep.mubr.f32.mxu1 %v3153_v1 }
 0x1a7   : > { %v644_v31 = vpop.trf.xlu1 }
 0x1a8   : > { %1760 = vmatmul.mubr.msk.f32.gmra.mrb[4].mxu1 %vm690_vm2, %v644_v31 }
 0x1a9   : > { %876 = vmatprep.mubr.f32.mxu1 %v3153_v1 }
 0x1ab   : > { %v645_v32 = vpop.trf.xlu1 }
 0x1ac   : > { %1761 = vmatmul.mubr.msk.f32.gmra.mrb[6].mxu1 %vm690_vm2, %v645_v32 }
 0x1ad   : > { %882 = vmatprep.mubr.f32.mxu1 %v3153_v1 }
 0x1af   : > { %v646_v33 = vpop.trf.xlu1 }
 0x1b0   : > { %1762 = vmatmul.mubr.msk.f32.gmra.mrb[8].mxu1 %vm690_vm2, %v646_v33 }
 0x1b1   : > { %888 = vmatprep.mubr.f32.mxu1 %v3153_v1 }
 0x1b3   : > { %v647_v34 = vpop.trf.xlu1 }
 0x1b4   : > { %1763 = vmatmul.mubr.msk.f32.gmra.mrb[10].mxu1 %vm690_vm2, %v647_v34 }
 0x1b5   : > { %894 = vmatprep.mubr.f32.mxu1 %v3153_v1 }
 0x1b7   : > { %v648_v35 = vpop.trf.xlu1 }
 0x1b8   : > { %1764 = vmatmul.mubr.msk.f32.gmra.mrb[12].mxu1 %vm690_vm2, %v648_v35 }
 0x1b9   : > { %900 = vmatprep.mubr.f32.mxu1 %v3153_v1 }
 0x1bb   : > { %v649_v36 = vpop.trf.xlu1 }
 0x1bc   : > { %1765 = vmatmul.mubr.msk.f32.gmra.mrb[14].mxu1 %vm690_vm2, %v649_v36 }
 0x1bd   : > { %906 = vmatprep.mubr.f32.mxu1 %v3153_v1 }
 0x1bf   : > { %v650_v37 = vpop.trf.xlu1 }
 0x1c0   : > { %1766 = vmatmul.mubr.msk.f32.gmra.mrb[16].mxu1 %vm690_vm2, %v650_v37 }
 0x1c1   : > { %912 = vmatprep.mubr.f32.mxu1 %v3153_v1 }
 0x1c3   : > { %v651_v38 = vpop.trf.xlu1 }
 0x1c4   : > { %1767 = vmatmul.mubr.msk.f32.gmra.mrb[18].mxu1 %vm690_vm2, %v651_v38 }
 0x1c5   : > { %918 = vmatprep.mubr.f32.mxu1 %v3153_v1 }
 0x1c7   : > { %v652_v39 = vpop.trf.xlu1 }
 0x1c8   : > { %1768 = vmatmul.mubr.msk.f32.gmra.mrb[20].mxu1 %vm690_vm2, %v652_v39 }
 0x1c9   : > { %924 = vmatprep.mubr.f32.mxu1 %v3153_v1 }
 0x1cb   : > { %v653_v40 = vpop.trf.xlu1 }
 0x1cc   : > { %1769 = vmatmul.mubr.msk.f32.gmra.mrb[22].mxu1 %vm690_vm2, %v653_v40 }
 0x1cd   : > { %930 = vmatprep.mubr.f32.mxu1 %v3153_v1 }
 0x1cf   : > { %v654_v41 = vpop.trf.xlu1 }
 0x1d0   : > { %1770 = vmatmul.mubr.msk.f32.gmra.mrb[24].mxu1 %vm690_vm2, %v654_v41 }
 0x1d1   : > { %936 = vmatprep.mubr.f32.mxu1 %v3153_v1 }
 0x1d3   : > { %v655_v42 = vpop.trf.xlu1 }
 0x1d4   : > { %1771 = vmatmul.mubr.msk.f32.gmra.mrb[26].mxu1 %vm690_vm2, %v655_v42 }
 0x1d5   : > { %942 = vmatprep.mubr.f32.mxu1 %v3153_v1 }
 0x1d7   : > { %v656_v43 = vpop.trf.xlu1 }
 0x1d8   : > { %1772 = vmatmul.mubr.msk.f32.gmra.mrb[28].mxu1 %vm690_vm2, %v656_v43 }
 0x1d9   : > { %948 = vmatprep.mubr.f32.mxu1 %v3153_v1 }
 0x1db   : > { %v657_v44 = vpop.trf.xlu1 }
 0x1dc   : > { %1773 = vmatmul.mubr.msk.f32.gmra.mrb[30].mxu1 %vm690_vm2, %v657_v44 }
 0x1dd   : > { %954 = vmatprep.mubr.f32.mxu1 %v3153_v1 }
 0x1df   : > { %v674_v45 = vpop.trf.xlu1 }
 0x1e0   : > { %1774 = vmatmul.mubr.msk.f32.gmra.mrb[32].mxu1 %vm690_vm2, %v674_v45 }
 0x1e1   : > { %960 = vmatprep.mubr.f32.mxu1 %v3153_v1 }
 0x1e3   : > { %v675_v46 = vpop.trf.xlu1 }
 0x1e4   : > { %1775 = vmatmul.mubr.msk.f32.gmra.mrb[34].mxu1 %vm690_vm2, %v675_v46 }
 0x1e5   : > { %966 = vmatprep.mubr.f32.mxu1 %v3153_v1 }
 0x1e7   : > { %v676_v47 = vpop.trf.xlu1 }
 0x1e8   : > { %1776 = vmatmul.mubr.msk.f32.gmra.mrb[36].mxu1 %vm690_vm2, %v676_v47 }
 0x1e9   : > { %972 = vmatprep.mubr.f32.mxu1 %v3153_v1 }
 0x1eb   : > { %v677_v48 = vpop.trf.xlu1 }
 0x1ec   : > { %1777 = vmatmul.mubr.msk.f32.gmra.mrb[38].mxu1 %vm690_vm2, %v677_v48 }
 0x1ed   : > { %978 = vmatprep.mubr.f32.mxu1 %v3153_v1 }
 0x1ef   : > { %v678_v49 = vpop.trf.xlu1 }
 0x1f0   : > { %1778 = vmatmul.mubr.msk.f32.gmra.mrb[40].mxu1 %vm690_vm2, %v678_v49 }
 0x1f1   : > { %984 = vmatprep.mubr.f32.mxu1 %v3153_v1 }
 0x1f3   : > { %v679_v50 = vpop.trf.xlu1 }
 0x1f4   : > { %1779 = vmatmul.mubr.msk.f32.gmra.mrb[42].mxu1 %vm690_vm2, %v679_v50 }
 0x1f5   : > { %990 = vmatprep.mubr.f32.mxu1 %v3153_v1 }
 0x1f7   : > { %v680_v51 = vpop.trf.xlu1 }
 0x1f8   : > { %1780 = vmatmul.mubr.msk.f32.gmra.mrb[44].mxu1 %vm690_vm2, %v680_v51 }
 0x1f9   : > { %996 = vmatprep.mubr.f32.mxu1 %v3153_v1 }
 0x1fb   : > { %v681_v52 = vpop.trf.xlu1 }
 0x1fc   : > { %1781 = vmatmul.mubr.msk.f32.gmra.mrb[46].mxu1 %vm690_vm2, %v681_v52 }
 0x1fd   : > { %1002 = vmatprep.mubr.f32.mxu1 %v3153_v1 }
 0x1ff   : > { %v682_v53 = vpop.trf.xlu1 }
 0x200   : > { %1782 = vmatmul.mubr.msk.f32.gmra.mrb[48].mxu1 %vm690_vm2, %v682_v53 }
 0x201   : > { %1008 = vmatprep.mubr.f32.mxu1 %v3153_v1 }
 0x203   : > { %v683_v54 = vpop.trf.xlu1 }
 0x204   : > { %1783 = vmatmul.mubr.msk.f32.gmra.mrb[50].mxu1 %vm690_vm2, %v683_v54 }
 0x205   : > { %1014 = vmatprep.mubr.f32.mxu1 %v3153_v1 }
 0x207   : > { %v684_v55 = vpop.trf.xlu1 }
 0x208   : > { %1784 = vmatmul.mubr.msk.f32.gmra.mrb[52].mxu1 %vm690_vm2, %v684_v55 }
 0x209   : > { %1020 = vmatprep.mubr.f32.mxu1 %v3153_v1 }
 0x20b   : > { %v685_v56 = vpop.trf.xlu1 }
 0x20c   : > { %1785 = vmatmul.mubr.msk.f32.gmra.mrb[54].mxu1 %vm690_vm2, %v685_v56 }
 0x20d   : > { %1026 = vmatprep.mubr.f32.mxu1 %v3153_v1 }
 0x20f   : > { %v686_v57 = vpop.trf.xlu1 }
 0x210   : > { %1786 = vmatmul.mubr.msk.f32.gmra.mrb[56].mxu1 %vm690_vm2, %v686_v57 }
 0x211   : > { %1032 = vmatprep.mubr.f32.mxu1 %v3153_v1 }
 0x213   : > { %v687_v58 = vpop.trf.xlu1 }
 0x214   : > { %1787 = vmatmul.mubr.msk.f32.gmra.mrb[58].mxu1 %vm690_vm2, %v687_v58 }
 0x215   : > { %1038 = vmatprep.mubr.f32.mxu1 %v3153_v1 }
 0x217   : > { %v688_v59 = vpop.trf.xlu1 }
 0x218   : > { %1788 = vmatmul.mubr.msk.f32.gmra.mrb[60].mxu1 %vm690_vm2, %v688_v59 }
 0x219   : > { %1044 = vmatprep.mubr.f32.mxu1 %v3153_v1 }
 0x21b   : > { %v689_v60 = vpop.trf.xlu1 }
 0x21c   : > { %1789 = vmatmul.mubr.msk.f32.gmra.mrb[62].mxu1 %vm690_vm2, %v689_v60 }
 0x273   : > { %v2499_v61 = vpop.f32.mrb[0].mxu1 }
 0x274   : > { %v2501_v62 = vpop.f32.mrb[1].mxu1 }
 0x275   : > { %v1051_v63 = vmax.f32 %v2499_v61, %v2501_v62 }
 0x277   : > { %1052 = vmax.xlane.f32.xlu0 %v1051_v63  ;;  %v2505_v0 = vpop.f32.mrb[2].mxu1 }
 0x278   : > { %v2507_v2 = vpop.f32.mrb[3].mxu1 }
 0x279   : > { %v1054_v3 = vmax.f32 %v2505_v0, %v2507_v2 }
 0x27b   : > { %1055 = vmax.xlane.f32.xlu0 %v1054_v3  ;;  %v2511_v4 = vpop.f32.mrb[4].mxu1 }
 0x27c   : > { %v2513_v5 = vpop.f32.mrb[5].mxu1 }
 0x27d   : > { %v1057_v6 = vmax.f32 %v2511_v4, %v2513_v5 }
 0x27f   : > { %1058 = vmax.xlane.f32.xlu0 %v1057_v6  ;;  %v2517_v7 = vpop.f32.mrb[6].mxu1 }
 0x280   : > { %v2519_v8 = vpop.f32.mrb[7].mxu1 }
 0x281   : > { %v1060_v9 = vmax.f32 %v2517_v7, %v2519_v8 }
 0x283   : > { %1061 = vmax.xlane.f32.xlu0 %v1060_v9  ;;  %v2523_v10 = vpop.f32.mrb[8].mxu1 }
 0x284   : > { %v2525_v11 = vpop.f32.mrb[9].mxu1 }
 0x285   : > { %v1063_v12 = vmax.f32 %v2523_v10, %v2525_v11 }
 0x287   : > { %1064 = vmax.xlane.f32.xlu0 %v1063_v12  ;;  %v2529_v13 = vpop.f32.mrb[10].mxu1 }
 0x288   : > { %v2531_v14 = vpop.f32.mrb[11].mxu1 }
 0x289   : > { %v1066_v15 = vmax.f32 %v2529_v13, %v2531_v14 }
 0x28b   : > { %1067 = vmax.xlane.f32.xlu0 %v1066_v15  ;;  %v2535_v16 = vpop.f32.mrb[12].mxu1 }
 0x28c   : > { %v2537_v17 = vpop.f32.mrb[13].mxu1 }
 0x28d   : > { %v1069_v18 = vmax.f32 %v2535_v16, %v2537_v17 }
 0x28f   : > { %1070 = vmax.xlane.f32.xlu0 %v1069_v18  ;;  %v2541_v19 = vpop.f32.mrb[14].mxu1 }
 0x290   : > { %v2543_v20 = vpop.f32.mrb[15].mxu1 }
 0x291   : > { %v1072_v21 = vmax.f32 %v2541_v19, %v2543_v20 }
 0x293   : > { %1073 = vmax.xlane.f32.xlu0 %v1072_v21  ;;  %v2547_v22 = vpop.f32.mrb[16].mxu1 }
 0x294   : > { %v2549_v23 = vpop.f32.mrb[17].mxu1 }
 0x295   : > { %v1075_v24 = vmax.f32 %v2547_v22, %v2549_v23 }
 0x297   : > { %1076 = vmax.xlane.f32.xlu1 %v1075_v24  ;;  %v2553_v25 = vpop.f32.mrb[18].mxu1 }
 0x298   : > { %v2555_v26 = vpop.f32.mrb[19].mxu1 }
 0x299   : > { %v1078_v27 = vmax.f32 %v2553_v25, %v2555_v26 }
 0x29b   : > { %1079 = vmax.xlane.f32.xlu0 %v1078_v27  ;;  %v2559_v28 = vpop.f32.mrb[20].mxu1 }
 0x29c   : > { %v2561_v29 = vpop.f32.mrb[21].mxu1 }
 0x29d   : > { %v1081_v30 = vmax.f32 %v2559_v28, %v2561_v29 }
 0x29f   : > { %1082 = vmax.xlane.f32.xlu0 %v1081_v30  ;;  %v2565_v31 = vpop.f32.mrb[22].mxu1 }
 0x2a0   : > { %v2567_v32 = vpop.f32.mrb[23].mxu1 }
 0x2a1   : > { %v1084_v33 = vmax.f32 %v2565_v31, %v2567_v32 }
 0x2a3   : > { %1085 = vmax.xlane.f32.xlu0 %v1084_v33  ;;  %v2571_v34 = vpop.f32.mrb[24].mxu1 }
 0x2a4   : > { %v2573_v35 = vpop.f32.mrb[25].mxu1 }
 0x2a5   : > { %v1087_v36 = vmax.f32 %v2571_v34, %v2573_v35 }
 0x2a7   : > { %1088 = vmax.xlane.f32.xlu0 %v1087_v36  ;;  %v2577_v37 = vpop.f32.mrb[26].mxu1 }
 0x2a8   : > { %v2579_v38 = vpop.f32.mrb[27].mxu1 }
 0x2a9   : > { %v1090_v39 = vmax.f32 %v2577_v37, %v2579_v38 }
 0x2ab   : > { %1091 = vmax.xlane.f32.xlu0 %v1090_v39  ;;  %v2583_v40 = vpop.f32.mrb[28].mxu1 }
 0x2ac   : > { %v2585_v41 = vpop.f32.mrb[29].mxu1 }
 0x2ad   : > { %v1093_v42 = vmax.f32 %v2583_v40, %v2585_v41 }
 0x2af   : > { %1094 = vmax.xlane.f32.xlu0 %v1093_v42  ;;  %v2589_v43 = vpop.f32.mrb[30].mxu1 }
 0x2b0   : > { %v2591_v44 = vpop.f32.mrb[31].mxu1 }
 0x2b1   : > { %v1096_v45 = vmax.f32 %v2589_v43, %v2591_v44 }
 0x2b3   : > { %1097 = vmax.xlane.f32.xlu0 %v1096_v45  ;;  %v2595_v46 = vpop.f32.mrb[32].mxu1 }
 0x2b4   : > { %v2597_v47 = vpop.f32.mrb[33].mxu1 }
 0x2b5   : > { %v1099_v48 = vmax.f32 %v2595_v46, %v2597_v47 }
 0x2b7   : > { %1100 = vmax.xlane.f32.xlu0 %v1099_v48  ;;  %v2601_v49 = vpop.f32.mrb[34].mxu1 }
 0x2b8   : > { %v2603_v50 = vpop.f32.mrb[35].mxu1 }
 0x2b9   : > { %v1102_v51 = vmax.f32 %v2601_v49, %v2603_v50 }
 0x2bb   : > { %1103 = vmax.xlane.f32.xlu0 %v1102_v51  ;;  %v2607_v52 = vpop.f32.mrb[36].mxu1  ;;  %v336_v51 = vld [vmem:[%s3148_s5] sm:$0xff] }
 0x2bc   : > { %v2609_v53 = vpop.f32.mrb[37].mxu1  ;;  %1752 = vmatmul.mubr.msk.f32.vlgmr.msra.gmra.mrb[4].mxu0 %vm346_vm0, %v336_v51 }
 0x2bd   : > { %v1105_v54 = vmax.f32 %v2607_v52, %v2609_v53  ;;  %607 = vmatprep.mubr.f32.mxu0 %v3153_v1 }
 0x2bf   : > { %1106 = vmax.xlane.f32.xlu0 %v1105_v54  ;;  %v2613_v55 = vpop.f32.mrb[38].mxu1 }
 0x2c0   : > { %v2615_v56 = vpop.f32.mrb[39].mxu1 }
 0x2c1   : > { %v1108_v57 = vmax.f32 %v2613_v55, %v2615_v56 }
 0x2c3   : > { %1109 = vmax.xlane.f32.xlu0 %v1108_v57  ;;  %v2619_v58 = vpop.f32.mrb[40].mxu1 }
 0x2c4   : > { %v2621_v59 = vpop.f32.mrb[41].mxu1 }
 0x2c5   : > { %v1111_v60 = vmax.f32 %v2619_v58, %v2621_v59 }
 0x2c7   : > { %1112 = vmax.xlane.f32.xlu0 %v1111_v60  ;;  %v2625_v63 = vpop.f32.mrb[42].mxu1 }
 0x2c8   : > { %v2627_v3 = vpop.f32.mrb[43].mxu1 }
 0x2c9   : > { %v1114_v6 = vmax.f32 %v2625_v63, %v2627_v3 }
 0x2cb   : > { %1115 = vmax.xlane.f32.xlu0 %v1114_v6  ;;  %v2631_v9 = vpop.f32.mrb[44].mxu1 }
 0x2cc   : > { %v2633_v12 = vpop.f32.mrb[45].mxu1 }
 0x2cd   : > { %v1117_v15 = vmax.f32 %v2631_v9, %v2633_v12 }
 0x2cf   : > { %1118 = vmax.xlane.f32.xlu0 %v1117_v15  ;;  %v2637_v18 = vpop.f32.mrb[46].mxu1 }
 0x2d0   : > { %v2639_v21 = vpop.f32.mrb[47].mxu1 }
 0x2d1   : > { %3186 = vst [vmem:[#allocation9_spill] sm:$0xff] %v2639_v21  ;;  %v1120_v24 = vmax.f32 %v2637_v18, %v2639_v21 }
 0x2d3   : > { %1121 = vmax.xlane.f32.xlu0 %v1120_v24  ;;  %v2643_v27 = vpop.f32.mrb[48].mxu1 }
 0x2d4   : > { %3187 = vst [vmem:[#allocation10_spill] sm:$0xff] %v2643_v27  ;;  %v2645_v30 = vpop.f32.mrb[49].mxu1 }
 0x2d5   : > { %3188 = vst [vmem:[#allocation11_spill] sm:$0xff] %v2645_v30  ;;  %v1123_v33 = vmax.f32 %v2643_v27, %v2645_v30 }
 0x2d7   : > { %1124 = vmax.xlane.f32.xlu0 %v1123_v33  ;;  %v2649_v36 = vpop.f32.mrb[50].mxu1 }
 0x2d8   : > { %3189 = vst [vmem:[#allocation12_spill] sm:$0xff] %v2649_v36  ;;  %v2651_v39 = vpop.f32.mrb[51].mxu1 }
 0x2d9   : > { %3190 = vst [vmem:[#allocation13_spill] sm:$0xff] %v2651_v39  ;;  %v1126_v42 = vmax.f32 %v2649_v36, %v2651_v39 }
 0x2db   : > { %1127 = vmax.xlane.f32.xlu0 %v1126_v42  ;;  %v2655_v45 = vpop.f32.mrb[52].mxu1 }
 0x2dc   : > { %3191 = vst [vmem:[#allocation14_spill] sm:$0xff] %v2655_v45  ;;  %v2657_v48 = vpop.f32.mrb[53].mxu1 }
 0x2dd   : > { %3192 = vst [vmem:[#allocation15_spill] sm:$0xff] %v2657_v48  ;;  %v1129_v54 = vmax.f32 %v2655_v45, %v2657_v48 }
 0x2df   : > { %1130 = vmax.xlane.f32.xlu0 %v1129_v54  ;;  %v2666_v57 = vpop.f32.mrb[54].mxu1  ;;  %v3199_v54 = vmov 0.0  }
 0x2e0   : > { %3193 = vst [vmem:[#allocation16_spill] sm:$0xff] %v2666_v57  ;;  %v2668_v60 = vpop.f32.mrb[55].mxu1 }
 0x2e1   : > { %3194 = vst [vmem:[#allocation17_spill] sm:$0xff] %v2668_v60  ;;  %v1132_v6 = vmax.f32 %v2666_v57, %v2668_v60 }
 0x2e3   : > { %1133 = vmax.xlane.f32.xlu0 %v1132_v6  ;;  %v2672_v15 = vpop.f32.mrb[56].mxu1 }
 0x2e4   : > { %3195 = vst [vmem:[#allocation18_spill] sm:$0xff] %v2672_v15  ;;  %v2674_v24 = vpop.f32.mrb[57].mxu1 }
 0x2e5   : > { %3196 = vst [vmem:[#allocation19_spill] sm:$0xff] %v2674_v24  ;;  %v1135_v33 = vmax.f32 %v2672_v15, %v2674_v24  ;;  %v337_v24 = vld [vmem:[%s3148_s5 + $0x8] sm:$0xff] }
 0x2e6   : > { %1753 = vmatmul.mubr.msk.f32.gmra.mrb[6].mxu0 %vm346_vm0, %v337_v24 }
 0x2e7   : > { %1136 = vmax.xlane.f32.xlu1 %v1135_v33  ;;  %v2678_v42 = vpop.f32.mrb[58].mxu1  ;;  %613 = vmatprep.mubr.f32.mxu0 %v3199_v54 }
 0x2e8   : > { %v2680_v51 = vpop.f32.mrb[59].mxu1 }
 0x2eb   : > { %v2684_v1 = vpop.f32.mrb[60].mxu1 }
 0x2ec   : > { %3197 = vst [vmem:[#allocation20_spill] sm:$0xff] %v2684_v1  ;;  %v2686_v48 = vpop.f32.mrb[61].mxu1 }
 0x2ed   : > { %3198 = vst [vmem:[#allocation21_spill] sm:$0xff] %v2686_v48  ;;  %v1141_v6 = vmax.f32 %v2684_v1, %v2686_v48  ;;  %v338_v48 = vld [vmem:[%s3148_s5 + $0x10] sm:$0xff] }
 0x2ee   : > { %1754 = vmatmul.mubr.msk.f32.gmra.mrb[8].mxu0 %vm346_vm0, %v338_v48 }
 0x2ef   : > { %1142 = vmax.xlane.f32.xlu1 %v1141_v6  ;;  %v2690_v60 = vpop.f32.mrb[62].mxu1  ;;  %619 = vmatprep.mubr.f32.mxu0 %v3199_v54  ;;  %v339_v6 = vld [vmem:[%s3148_s5 + $0x18] sm:$0xff] }
 0x2f0   : > { %v2692_v57 = vpop.f32.mrb[63].mxu1 }
 0x2f2   : > { %1755 = vmatmul.mubr.msk.f32.gmra.mrb[10].mxu0 %vm346_vm0, %v339_v6 }
 0x304   : > { %v1053_v33 = vpop.xlane.xlu0 %1052 }
 0x305   : > { %v1147_v1 = vsub.f32 %v2499_v61, %v1053_v33  ;;  %v1148_v24 = vsub.f32 %v2501_v62, %v1053_v33 }
 0x307   : > { %v1211_v15 = vmul.f32 1.442695, %v1147_v1  ;;  %v1213_v45 = vmul.f32 1.442695, %v1148_v24 }
 0x308   : > { %v1056_v39 = vpop.xlane.xlu0 %1055 }
 0x309   : > { %1940 = vpow2.f32 %v1211_v15  ;;  %v1149_v36 = vsub.f32 %v2505_v0, %v1056_v39  ;;  %v1150_v48 = vsub.f32 %v2507_v2, %v1056_v39 }
 0x30a   : > { %1942 = vpow2.f32 %v1213_v45 }
 0x30b   : > { %v1215_v54 = vmul.f32 1.442695, %v1149_v36  ;;  %v1217_v30 = vmul.f32 1.442695, %v1150_v48 }
 0x30c   : > { %v1059_v27 = vpop.xlane.xlu0 %1058 }
 0x30d   : > { %1944 = vpow2.f32 %v1215_v54  ;;  %v1151_v6 = vsub.f32 %v2511_v4, %v1059_v27  ;;  %v1152_v21 = vsub.f32 %v2513_v5, %v1059_v27 }
 0x30e   : > { %1946 = vpow2.f32 %v1217_v30 }
 0x30f   : > { %v1219_v61 = vmul.f32 1.442695, %v1151_v6  ;;  %v1221_v62 = vmul.f32 1.442695, %v1152_v21 }
 0x310   : > { %v1062_v1 = vpop.xlane.xlu0 %1061 }
 0x311   : > { %1948 = vpow2.f32 %v1219_v61  ;;  %v1153_v15 = vsub.f32 %v2517_v7, %v1062_v1  ;;  %v1154_v0 = vsub.f32 %v2519_v8, %v1062_v1 }
 0x312   : > { %1950 = vpow2.f32 %v1221_v62 }
 0x313   : > { %v2718_v2 = vpop.eup %1940  ;;  %v1223_v36 = vmul.f32 1.442695, %v1153_v15  ;;  %v1225_v39 = vmul.f32 1.442695, %v1154_v0 }
 0x314   : > { %v2720_v45 = vpop.eup %1942  ;;  %v1065_v33 = vpop.xlane.xlu0 %1064 }
 0x315   : > { %1952 = vpow2.f32 %v1223_v36  ;;  %v1155_v4 = vsub.f32 %v2523_v10, %v1065_v33  ;;  %v1156_v5 = vsub.f32 %v2525_v11, %v1065_v33  ;;  %v1339_v21 = vadd.f32 %v2720_v45, %v2718_v2 }
 0x316   : > { %1954 = vpow2.f32 %v1225_v39 }
 0x317   : > { %v2726_v7 = vpop.eup %1944  ;;  %v1227_v8 = vmul.f32 1.442695, %v1155_v4  ;;  %v1229_v27 = vmul.f32 1.442695, %v1156_v5  ;;  %1340 = vadd.xlane.f32.xlu0 %v1339_v21 }
 0x318   : > { %v2728_v30 = vpop.eup %1946  ;;  %v1068_v24 = vpop.xlane.xlu0 %1067 }
 0x319   : > { %1956 = vpow2.f32 %v1227_v8  ;;  %v1157_v48 = vsub.f32 %v2529_v13, %v1068_v24  ;;  %v1158_v54 = vsub.f32 %v2531_v14, %v1068_v24  ;;  %v1342_v10 = vadd.f32 %v2728_v30, %v2726_v7 }
 0x31a   : > { %1958 = vpow2.f32 %v1229_v27 }
 0x31b   : > { %v2734_v11 = vpop.eup %1948  ;;  %v1231_v6 = vmul.f32 1.442695, %v1157_v48  ;;  %v1233_v61 = vmul.f32 1.442695, %v1158_v54  ;;  %1343 = vadd.xlane.f32.xlu0 %v1342_v10 }
 0x31c   : > { %v2736_v62 = vpop.eup %1950  ;;  %v1071_v1 = vpop.xlane.xlu0 %1070 }
 0x31d   : > { %1960 = vpow2.f32 %v1231_v6  ;;  %v1159_v15 = vsub.f32 %v2535_v16, %v1071_v1  ;;  %v1160_v0 = vsub.f32 %v2537_v17, %v1071_v1  ;;  %v1345_v13 = vadd.f32 %v2736_v62, %v2734_v11 }
 0x31e   : > { %1962 = vpow2.f32 %v1233_v61 }
 0x31f   : > { %v2742_v14 = vpop.eup %1952  ;;  %v1235_v36 = vmul.f32 1.442695, %v1159_v15  ;;  %v1237_v39 = vmul.f32 1.442695, %v1160_v0  ;;  %1346 = vadd.xlane.f32.xlu0 %v1345_v13 }
 0x320   : > { %v2744_v33 = vpop.eup %1954  ;;  %v1074_v4 = vpop.xlane.xlu0 %1073 }
 0x321   : > { %1964 = vpow2.f32 %v1235_v36  ;;  %v1161_v5 = vsub.f32 %v2541_v19, %v1074_v4  ;;  %v1162_v21 = vsub.f32 %v2543_v20, %v1074_v4  ;;  %v1348_v16 = vadd.f32 %v2744_v33, %v2742_v14 }
 0x322   : > { %1966 = vpow2.f32 %v1237_v39 }
 0x323   : > { %v2750_v17 = vpop.eup %1956  ;;  %v1239_v8 = vmul.f32 1.442695, %v1161_v5  ;;  %v1241_v27 = vmul.f32 1.442695, %v1162_v21  ;;  %1349 = vadd.xlane.f32.xlu0 %v1348_v16 }
 0x324   : > { %v2752_v24 = vpop.eup %1958  ;;  %v1077_v48 = vpop.xlane.xlu1 %1076 }
 0x325   : > { %1968 = vpow2.f32 %v1239_v8  ;;  %v1163_v54 = vsub.f32 %v2547_v22, %v1077_v48  ;;  %v1164_v10 = vsub.f32 %v2549_v23, %v1077_v48  ;;  %v1351_v19 = vadd.f32 %v2752_v24, %v2750_v17 }
 0x326   : > { %1970 = vpow2.f32 %v1241_v27  ;;  %v3200_v48 = vmax.f32 %v2678_v42, %v2680_v51 }
 0x327   : > { %v2758_v20 = vpop.eup %1960  ;;  %v1243_v6 = vmul.f32 1.442695, %v1163_v54  ;;  %v1245_v61 = vmul.f32 1.442695, %v1164_v10  ;;  %1352 = vadd.xlane.f32.xlu0 %v1351_v19 }
 0x328   : > { %v2760_v1 = vpop.eup %1962  ;;  %v1080_v15 = vpop.xlane.xlu0 %1079 }
 0x329   : > { %1972 = vpow2.f32 %v1243_v6  ;;  %v1165_v0 = vsub.f32 %v2553_v25, %v1080_v15  ;;  %v1166_v13 = vsub.f32 %v2555_v26, %v1080_v15  ;;  %v1354_v22 = vadd.f32 %v2760_v1, %v2758_v20 }
 0x32a   : > { %1974 = vpow2.f32 %v1245_v61 }
 0x32b   : > { %v2766_v23 = vpop.eup %1964  ;;  %v1247_v36 = vmul.f32 1.442695, %v1165_v0  ;;  %v1249_v39 = vmul.f32 1.442695, %v1166_v13  ;;  %1355 = vadd.xlane.f32.xlu0 %v1354_v22 }
 0x32c   : > { %v2768_v4 = vpop.eup %1966  ;;  %v1083_v5 = vpop.xlane.xlu0 %1082 }
 0x32d   : > { %1976 = vpow2.f32 %v1247_v36  ;;  %v1167_v21 = vsub.f32 %v2559_v28, %v1083_v5  ;;  %v1168_v16 = vsub.f32 %v2561_v29, %v1083_v5  ;;  %v1357_v25 = vadd.f32 %v2768_v4, %v2766_v23 }
 0x32e   : > { %1978 = vpow2.f32 %v1249_v39 }
 0x32f   : > { %v2774_v26 = vpop.eup %1968  ;;  %v1251_v8 = vmul.f32 1.442695, %v1167_v21  ;;  %v1253_v27 = vmul.f32 1.442695, %v1168_v16  ;;  %1139 = vmax.xlane.f32.xlu0 %v3200_v48  ;;  %1358 = vadd.xlane.f32.xlu1 %v1357_v25  ;;  %v3201_v21 = vmax.f32 %v2690_v60, %v2692_v57 }
 0x330   : > { %v2779_v54 = vpop.eup %1970  ;;  %v1086_v10 = vpop.xlane.xlu0 %1085 }
 0x331   : > { %1980 = vpow2.f32 %v1251_v8  ;;  %v1169_v28 = vsub.f32 %v2565_v31, %v1086_v10  ;;  %v1170_v29 = vsub.f32 %v2567_v32, %v1086_v10  ;;  %v1360_v19 = vadd.f32 %v2779_v54, %v2774_v26 }
 0x332   : > { %1982 = vpow2.f32 %v1253_v27 }
 0x333   : > { %v2785_v6 = vpop.eup %1972  ;;  %v1255_v61 = vmul.f32 1.442695, %v1169_v28  ;;  %v1257_v15 = vmul.f32 1.442695, %v1170_v29  ;;  %1361 = vadd.xlane.f32.xlu0 %v1360_v19 }
 0x334   : > { %v2787_v0 = vpop.eup %1974  ;;  %v1089_v13 = vpop.xlane.xlu0 %1088 }
 0x335   : > { %1984 = vpow2.f32 %v1255_v61  ;;  %v1171_v22 = vsub.f32 %v2571_v34, %v1089_v13  ;;  %v1172_v36 = vsub.f32 %v2573_v35, %v1089_v13  ;;  %v1363_v31 = vadd.f32 %v2787_v0, %v2785_v6 }
 0x336   : > { %1986 = vpow2.f32 %v1257_v15 }
 0x337   : > { %v2793_v32 = vpop.eup %1976  ;;  %v1259_v39 = vmul.f32 1.442695, %v1171_v22  ;;  %v1261_v5 = vmul.f32 1.442695, %v1172_v36  ;;  %1145 = vmax.xlane.f32.xlu0 %v3201_v21  ;;  %1364 = vadd.xlane.f32.xlu1 %v1363_v31 }
 0x338   : > { %v2798_v16 = vpop.eup %1978  ;;  %v1092_v25 = vpop.xlane.xlu0 %1091 }
 0x339   : > { %1988 = vpow2.f32 %v1259_v39  ;;  %v1173_v34 = vsub.f32 %v2577_v37, %v1092_v25  ;;  %v1174_v35 = vsub.f32 %v2579_v38, %v1092_v25  ;;  %v1366_v8 = vadd.f32 %v2798_v16, %v2793_v32 }
 0x33a   : > { %1990 = vpow2.f32 %v1261_v5 }
 0x33b   : > { %v2804_v27 = vpop.eup %1980  ;;  %v1263_v48 = vmul.f32 1.442695, %v1173_v34  ;;  %v1265_v10 = vmul.f32 1.442695, %v1174_v35  ;;  %1367 = vadd.xlane.f32.xlu0 %v1366_v8 }
 0x33c   : > { %v2806_v28 = vpop.eup %1982  ;;  %v1095_v29 = vpop.xlane.xlu0 %1094 }
 0x33d   : > { %1992 = vpow2.f32 %v1263_v48  ;;  %v1175_v19 = vsub.f32 %v2583_v40, %v1095_v29  ;;  %v1176_v61 = vsub.f32 %v2585_v41, %v1095_v29  ;;  %v1369_v37 = vadd.f32 %v2806_v28, %v2804_v27 }
 0x33e   : > { %1994 = vpow2.f32 %v1265_v10 }
 0x33f   : > { %v2812_v38 = vpop.eup %1984  ;;  %v1267_v15 = vmul.f32 1.442695, %v1175_v19  ;;  %v1269_v13 = vmul.f32 1.442695, %v1176_v61  ;;  %1370 = vadd.xlane.f32.xlu1 %v1369_v37 }
 0x340   : > { %v2814_v22 = vpop.eup %1986  ;;  %v1098_v36 = vpop.xlane.xlu0 %1097 }
 0x341   : > { %1996 = vpow2.f32 %v1267_v15  ;;  %v1177_v31 = vsub.f32 %v2589_v43, %v1098_v36  ;;  %v1178_v39 = vsub.f32 %v2591_v44, %v1098_v36  ;;  %v1372_v40 = vadd.f32 %v2814_v22, %v2812_v38 }
 0x342   : > { %1998 = vpow2.f32 %v1269_v13 }
 0x343   : > { %v2820_v41 = vpop.eup %1988  ;;  %v1271_v5 = vmul.f32 1.442695, %v1177_v31  ;;  %v1273_v21 = vmul.f32 1.442695, %v1178_v39  ;;  %1373 = vadd.xlane.f32.xlu0 %v1372_v40 }
 0x344   : > { %v2822_v25 = vpop.eup %1990  ;;  %v1101_v34 = vpop.xlane.xlu0 %1100 }
 0x345   : > { %2000 = vpow2.f32 %v1271_v5  ;;  %v1179_v35 = vsub.f32 %v2595_v46, %v1101_v34  ;;  %v1180_v8 = vsub.f32 %v2597_v47, %v1101_v34  ;;  %v1375_v43 = vadd.f32 %v2822_v25, %v2820_v41 }
 0x346   : > { %2002 = vpow2.f32 %v1273_v21 }
 0x347   : > { %v2828_v44 = vpop.eup %1992  ;;  %v1275_v48 = vmul.f32 1.442695, %v1179_v35  ;;  %v1277_v10 = vmul.f32 1.442695, %v1180_v8  ;;  %1376 = vadd.xlane.f32.xlu1 %v1375_v43 }
 0x348   : > { %v2830_v29 = vpop.eup %1994  ;;  %v1104_v19 = vpop.xlane.xlu0 %1103 }
 0x349   : > { %2004 = vpow2.f32 %v1275_v48  ;;  %v1181_v61 = vsub.f32 %v2601_v49, %v1104_v19  ;;  %v1182_v37 = vsub.f32 %v2603_v50, %v1104_v19  ;;  %v1378_v46 = vadd.f32 %v2830_v29, %v2828_v44 }
 0x34a   : > { %2006 = vpow2.f32 %v1277_v10 }
 0x34b   : > { %v2836_v47 = vpop.eup %1996  ;;  %v1279_v15 = vmul.f32 1.442695, %v1181_v61  ;;  %v1281_v13 = vmul.f32 1.442695, %v1182_v37  ;;  %1379 = vadd.xlane.f32.xlu0 %v1378_v46 }
 0x34c   : > { %v2838_v36 = vpop.eup %1998  ;;  %v1107_v31 = vpop.xlane.xlu0 %1106 }
 0x34d   : > { %2008 = vpow2.f32 %v1279_v15  ;;  %v1183_v39 = vsub.f32 %v2607_v52, %v1107_v31  ;;  %v1184_v40 = vsub.f32 %v2609_v53, %v1107_v31  ;;  %v1381_v49 = vadd.f32 %v2838_v36, %v2836_v47 }
 0x34e   : > { %2010 = vpow2.f32 %v1281_v13 }
 0x34f   : > { %v2844_v50 = vpop.eup %2000  ;;  %v1283_v5 = vmul.f32 1.442695, %v1183_v39  ;;  %v1285_v21 = vmul.f32 1.442695, %v1184_v40  ;;  %1382 = vadd.xlane.f32.xlu1 %v1381_v49 }
 0x350   : > { %v2846_v34 = vpop.eup %2002  ;;  %v1110_v35 = vpop.xlane.xlu0 %1109 }
 0x351   : > { %2012 = vpow2.f32 %v1283_v5  ;;  %v1185_v8 = vsub.f32 %v2613_v55, %v1110_v35  ;;  %v1186_v43 = vsub.f32 %v2615_v56, %v1110_v35  ;;  %v1384_v52 = vadd.f32 %v2846_v34, %v2844_v50 }
 0x352   : > { %2014 = vpow2.f32 %v1285_v21 }
 0x353   : > { %v2852_v53 = vpop.eup %2004  ;;  %v1287_v48 = vmul.f32 1.442695, %v1185_v8  ;;  %v1289_v10 = vmul.f32 1.442695, %v1186_v43  ;;  %1385 = vadd.xlane.f32.xlu0 %v1384_v52 }
 0x354   : > { %v2854_v19 = vpop.eup %2006  ;;  %v1113_v61 = vpop.xlane.xlu0 %1112 }
 0x355   : > { %2016 = vpow2.f32 %v1287_v48  ;;  %v1187_v37 = vsub.f32 %v2619_v58, %v1113_v61  ;;  %v1188_v46 = vsub.f32 %v2621_v59, %v1113_v61  ;;  %v1387_v55 = vadd.f32 %v2854_v19, %v2852_v53 }
 0x356   : > { %2018 = vpow2.f32 %v1289_v10 }
 0x357   : > { %v2860_v56 = vpop.eup %2008  ;;  %v1291_v15 = vmul.f32 1.442695, %v1187_v37  ;;  %v1293_v13 = vmul.f32 1.442695, %v1188_v46  ;;  %1388 = vadd.xlane.f32.xlu1 %v1387_v55  ;;  %v3202_v55 = vld [vmem:[#allocation9_spill] sm:$0xff] }
 0x358   : > { %v2862_v31 = vpop.eup %2010  ;;  %v1116_v39 = vpop.xlane.xlu0 %1115 }
 0x359   : > { %2020 = vpow2.f32 %v1291_v15  ;;  %v1189_v40 = vsub.f32 %v2625_v63, %v1116_v39  ;;  %v1190_v49 = vsub.f32 %v2627_v3, %v1116_v39  ;;  %v1390_v58 = vadd.f32 %v2862_v31, %v2860_v56 }
 0x35a   : > { %2022 = vpow2.f32 %v1293_v13 }
 0x35b   : > { %v2868_v59 = vpop.eup %2012  ;;  %v1295_v5 = vmul.f32 1.442695, %v1189_v40  ;;  %v1297_v21 = vmul.f32 1.442695, %v1190_v49  ;;  %1391 = vadd.xlane.f32.xlu0 %v1390_v58  ;;  %v3204_v58 = vld [vmem:[#allocation10_spill] sm:$0xff] }
 0x35c   : > { %v2870_v35 = vpop.eup %2014  ;;  %v1119_v8 = vpop.xlane.xlu0 %1118 }
 0x35d   : > { %2024 = vpow2.f32 %v1295_v5  ;;  %v1191_v43 = vsub.f32 %v2631_v9, %v1119_v8  ;;  %v1192_v52 = vsub.f32 %v2633_v12, %v1119_v8  ;;  %v1393_v63 = vadd.f32 %v2870_v35, %v2868_v59 }
 0x35e   : > { %2026 = vpow2.f32 %v1297_v21  ;;  %v3205_v21 = vld [vmem:[#allocation11_spill] sm:$0xff] }
 0x35f   : > { %v2876_v3 = vpop.eup %2016  ;;  %v1299_v48 = vmul.f32 1.442695, %v1191_v43  ;;  %v1301_v10 = vmul.f32 1.442695, %v1192_v52  ;;  %1394 = vadd.xlane.f32.xlu1 %v1393_v63 }
 0x360   : > { %v2878_v61 = vpop.eup %2018  ;;  %v1122_v37 = vpop.xlane.xlu0 %1121 }
 0x361   : > { %2028 = vpow2.f32 %v1299_v48  ;;  %v1193_v46 = vsub.f32 %v2637_v18, %v1122_v37  ;;  %v1194_v15 = vsub.f32 %v3202_v55, %v1122_v37  ;;  %v1396_v9 = vadd.f32 %v2878_v61, %v2876_v3  ;;  %v3207_v37 = vld [vmem:[#allocation12_spill] sm:$0xff]  ;;  %v3208_v55 = vld [vmem:[#allocation13_spill] sm:$0xff] }
 0x362   : > { %2030 = vpow2.f32 %v1301_v10 }
 0x363   : > { %v2884_v12 = vpop.eup %2020  ;;  %v1303_v13 = vmul.f32 1.442695, %v1193_v46  ;;  %v1305_v39 = vmul.f32 1.442695, %v1194_v15  ;;  %1397 = vadd.xlane.f32.xlu0 %v1396_v9 }
 0x364   : > { %3203 = vst [vmem:[#allocation9_spill] sm:$0xff] %v2884_v12  ;;  %v2886_v40 = vpop.eup %2022  ;;  %v1125_v49 = vpop.xlane.xlu0 %1124 }
 0x365   : > { %2032 = vpow2.f32 %v1303_v13  ;;  %v1195_v5 = vsub.f32 %v3204_v58, %v1125_v49  ;;  %v1196_v8 = vsub.f32 %v3205_v21, %v1125_v49  ;;  %v1399_v18 = vadd.f32 %v2886_v40, %v2884_v12  ;;  %v3211_v21 = vld [vmem:[#allocation14_spill] sm:$0xff] }
 0x366   : > { %2034 = vpow2.f32 %v1305_v39 }
 0x367   : > { %v2892_v43 = vpop.eup %2024  ;;  %v1307_v52 = vmul.f32 1.442695, %v1195_v5  ;;  %v1309_v63 = vmul.f32 1.442695, %v1196_v8  ;;  %1400 = vadd.xlane.f32.xlu1 %v1399_v18  ;;  %v3212_v18 = vld [vmem:[#allocation15_spill] sm:$0xff] }
 0x368   : > { %3206 = vst [vmem:[#allocation10_spill] sm:$0xff] %v2892_v43  ;;  %v2894_v48 = vpop.eup %2026  ;;  %v1128_v10 = vpop.xlane.xlu0 %1127 }
 0x369   : > { %2036 = vpow2.f32 %v1307_v52  ;;  %v1197_v46 = vsub.f32 %v3207_v37, %v1128_v10  ;;  %v1198_v15 = vsub.f32 %v3208_v55, %v1128_v10  ;;  %v1402_v9 = vadd.f32 %v2894_v48, %v2892_v43 }
 0x36a   : > { %2038 = vpow2.f32 %v1309_v63 }
 0x36b   : > { %v2900_v13 = vpop.eup %2028  ;;  %v1311_v39 = vmul.f32 1.442695, %v1197_v46  ;;  %v1313_v49 = vmul.f32 1.442695, %v1198_v15  ;;  %1403 = vadd.xlane.f32.xlu0 %v1402_v9  ;;  %v3213_v9 = vld [vmem:[#allocation16_spill] sm:$0xff] }
 0x36c   : > { %3209 = vst [vmem:[#allocation11_spill] sm:$0xff] %v2900_v13  ;;  %v2902_v58 = vpop.eup %2030  ;;  %v1131_v5 = vpop.xlane.xlu0 %1130 }
 0x36d   : > { %3210 = vst [vmem:[#allocation12_spill] sm:$0xff] %v2902_v58  ;;  %2040 = vpow2.f32 %v1311_v39  ;;  %v1199_v8 = vsub.f32 %v3211_v21, %v1131_v5  ;;  %v1200_v52 = vsub.f32 %v3212_v18, %v1131_v5  ;;  %v1405_v10 = vadd.f32 %v2902_v58, %v2900_v13  ;;  %v3214_v39 = vld [vmem:[#allocation17_spill] sm:$0xff] }
 0x36e   : > { %2042 = vpow2.f32 %v1313_v49 }
 0x36f   : > { %v2908_v37 = vpop.eup %2032  ;;  %v1315_v63 = vmul.f32 1.442695, %v1199_v8  ;;  %v1317_v55 = vmul.f32 1.442695, %v1200_v52  ;;  %1406 = vadd.xlane.f32.xlu1 %v1405_v10  ;;  %v3216_v10 = vld [vmem:[#allocation18_spill] sm:$0xff] }
 0x370   : > { %v2910_v46 = vpop.eup %2034  ;;  %v1134_v15 = vpop.xlane.xlu0 %1133 }
 0x371   : > { %2044 = vpow2.f32 %v1315_v63  ;;  %v1201_v12 = vsub.f32 %v3213_v9, %v1134_v15  ;;  %v1202_v43 = vsub.f32 %v3214_v39, %v1134_v15  ;;  %v1408_v5 = vadd.f32 %v2910_v46, %v2908_v37  ;;  %v3217_v63 = vld [vmem:[#allocation19_spill] sm:$0xff] }
 0x372   : > { %2046 = vpow2.f32 %v1317_v55 }
 0x373   : > { %v2916_v21 = vpop.eup %2036  ;;  %v1319_v49 = vmul.f32 1.442695, %v1201_v12  ;;  %v1321_v18 = vmul.f32 1.442695, %v1202_v43  ;;  %1409 = vadd.xlane.f32.xlu0 %v1408_v5 }
 0x374   : > { %3215 = vst [vmem:[#allocation13_spill] sm:$0xff] %v2916_v21  ;;  %v2918_v8 = vpop.eup %2038  ;;  %v1137_v52 = vpop.xlane.xlu1 %1136 }
 0x375   : > { %2048 = vpow2.f32 %v1319_v49  ;;  %v1203_v13 = vsub.f32 %v3216_v10, %v1137_v52  ;;  %v1204_v58 = vsub.f32 %v3217_v63, %v1137_v52  ;;  %v1411_v15 = vadd.f32 %v2918_v8, %v2916_v21 }
 0x376   : > { %2050 = vpow2.f32 %v1321_v18 }
 0x377   : > { %v2924_v9 = vpop.eup %2040  ;;  %v1323_v55 = vmul.f32 1.442695, %v1203_v13  ;;  %v1325_v39 = vmul.f32 1.442695, %v1204_v58  ;;  %1412 = vadd.xlane.f32.xlu1 %v1411_v15 }
 0x378   : > { %3218 = vst [vmem:[#allocation14_spill] sm:$0xff] %v2924_v9  ;;  %v2926_v12 = vpop.eup %2042 }
 0x379   : > { %3219 = vst [vmem:[#allocation15_spill] sm:$0xff] %v2926_v12  ;;  %2052 = vpow2.f32 %v1323_v55  ;;  %v1414_v43 = vadd.f32 %v2926_v12, %v2924_v9  ;;  %v501_v55 = vld [vmem:[%s3149_s6] sm:$0xff] }
 0x37a   : > { %2054 = vpow2.f32 %v1325_v39 }
 0x37b   : > { %v2930_v5 = vpop.eup %2044  ;;  %1415 = vadd.xlane.f32.xlu0 %v1414_v43  ;;  %v3226_v43 = vld [vmem:[#allocation20_spill] sm:$0xff] }
 0x37c   : > { %3220 = vst [vmem:[#allocation16_spill] sm:$0xff] %v2930_v5  ;;  %v2932_v49 = vpop.eup %2046  ;;  %v1143_v39 = vpop.xlane.xlu1 %1142 }
 0x37d   : > { %3221 = vst [vmem:[#allocation17_spill] sm:$0xff] %v2932_v49  ;;  %v1417_v18 = vadd.f32 %v2932_v49, %v2930_v5  ;;  %v3227_v49 = vld [vmem:[#allocation21_spill] sm:$0xff] }
 0x37f   : > { %v2936_v52 = vpop.eup %2048  ;;  %1418 = vadd.xlane.f32.xlu1 %v1417_v18  ;;  %v1207_v18 = vsub.f32 %v3226_v43, %v1143_v39 }
 0x380   : > { %3222 = vst [vmem:[#allocation18_spill] sm:$0xff] %v2936_v52  ;;  %v2938_v13 = vpop.eup %2050 }
 0x381   : > { %3223 = vst [vmem:[#allocation19_spill] sm:$0xff] %v2938_v13  ;;  %v1420_v58 = vadd.f32 %v2938_v13, %v2936_v52  ;;  %v1208_v52 = vsub.f32 %v3227_v49, %v1143_v39  ;;  %v1331_v13 = vmul.f32 1.442695, %v1207_v18 }
 0x383   : > { %v2942_v10 = vpop.eup %2052  ;;  %1421 = vadd.xlane.f32.xlu0 %v1420_v58  ;;  %v1333_v21 = vmul.f32 1.442695, %v1208_v52 }
 0x384   : > { %3224 = vst [vmem:[#allocation22_spill] sm:$0xff] %v2942_v10  ;;  %v2944_v63 = vpop.eup %2054 }
 0x385   : > { %3225 = vst [vmem:[#allocation23_spill] sm:$0xff] %v2944_v63  ;;  %v1423_v15 = vadd.f32 %v2944_v63, %v2942_v10 }
 0x387   : > { %1424 = vadd.xlane.f32.xlu1 %v1423_v15 }
 0x38f   : > { %v2953_v10 = vpop.f32.mrb[4].mxu0 }
 0x398   : > { %507 = vperm.xlu1 %1939, %v501_v55   ;;  %v2955_v55 = vpop.f32.mrb[5].mxu0 }
 0x399   : > { %3228 = vst [vmem:[#allocation20_spill] sm:$0xff] %v2955_v55 }
 0x3a4   : > { %v1341_v5 = vpop.xlane.xlu0 %1340 }
 0x3a5   : > { %2056 = vrcp.f32 %v1341_v5 }
 0x3a8   : > { %v1344_v58 = vpop.xlane.xlu0 %1343 }
 0x3a9   : > { %2058 = vrcp.f32 %v1344_v58 }
 0x3aa   : > { %2060 = vpow2.f32 %v1331_v13 }
 0x3ab   : > { %2062 = vpow2.f32 %v1333_v21 }
 0x3ac   : > { %v1347_v9 = vpop.xlane.xlu0 %1346 }
 0x3ad   : > { %2064 = vrcp.f32 %v1347_v9 }
 0x3af   : > { %v2057_v63 = vpop.eup %2056 }
 0x3b0   : > { %v1350_v15 = vpop.xlane.xlu0 %1349  ;;  %v1437_v49 = vmul.f32 %v2057_v63, %v2720_v45  ;;  %v1436_v52 = vmul.f32 %v2057_v63, %v2718_v2 }
 0x3b1   : > { %2066 = vrcp.f32 %v1350_v15 }
 0x3b3   : > { %v2059_v43 = vpop.eup %2058 }
 0x3b4   : > { %v1353_v12 = vpop.xlane.xlu0 %1352  ;;  %v1440_v5 = vmul.f32 %v2059_v43, %v2728_v30  ;;  %v1439_v13 = vmul.f32 %v2059_v43, %v2726_v7  ;;  %v2961_v39 = vpop.eup %2060 }
 0x3b5   : > { %v2963_v18 = vpop.eup %2062  ;;  %2068 = vrcp.f32 %v1353_v12 }
 0x3b6   : > { %v1822_v21 = vpack.c.bf16 %v1440_v5, %v1437_v49  ;;  %v1824_v9 = vpack.c.bf16 %v1439_v13, %v1436_v52  ;;  %v1429_v45 = vadd.f32 %v2963_v18, %v2961_v39 }
 0x3b7   : > { %v2065_v15 = vpop.eup %2064 }
 0x3b8   : > { %1823 = vmatprep.subr.bf16.mxu1 %v1822_v21  ;;  %v1356_v58 = vpop.xlane.xlu0 %1355  ;;  %v1443_v2 = vmul.f32 %v2065_v15, %v2736_v62  ;;  %v1442_v63 = vmul.f32 %v2065_v15, %v2734_v11 }
 0x3b9   : > { %2070 = vrcp.f32 %v1356_v58  ;;  %1825 = vmatpush1.bf16.xpose.msra.mxu1 %v1824_v9 }
 0x3bb   : > { %v2067_v30 = vpop.eup %2066 }
 0x3bc   : > { %v1140_v55 = vpop.xlane.xlu0 %1139  ;;  %1430 = vadd.xlane.f32.xlu1 %v1429_v45  ;;  %v1446_v7 = vmul.f32 %v2067_v30, %v2744_v33  ;;  %v1445_v43 = vmul.f32 %v2067_v30, %v2742_v14  ;;  %v1359_v5 = vpop.xlane.xlu1 %1358 }
 0x3bd   : > { %v1205_v12 = vsub.f32 %v2678_v42, %v1140_v55  ;;  %v1206_v49 = vsub.f32 %v2680_v51, %v1140_v55  ;;  %2072 = vrcp.f32 %v1359_v5 }
 0x3be   : > { %v1826_v52 = vpack.c.bf16 %v1446_v7, %v1443_v2  ;;  %v1828_v13 = vpack.c.bf16 %v1445_v43, %v1442_v63 }
 0x3bf   : > { %v1327_v21 = vmul.f32 1.442695, %v1205_v12  ;;  %v1329_v9 = vmul.f32 1.442695, %v1206_v49  ;;  %v2069_v45 = vpop.eup %2068 }
 0x3c0   : > { %1827 = vmatprep.subr.bf16.mxu1 %v1826_v52  ;;  %v1362_v58 = vpop.xlane.xlu0 %1361  ;;  %v1449_v14 = vmul.f32 %v2069_v45, %v2752_v24  ;;  %v1448_v51 = vmul.f32 %v2069_v45, %v2750_v17  ;;  %v503_v17 = vld [vmem:[%s3149_s6 + $0x10] sm:$0xff]  ;;  %v504_v45 = vld [vmem:[%s3149_s6 + $0x18] sm:$0xff] }
 0x3c1   : > { %2074 = vpow2.f32 %v1327_v21  ;;  %1829 = vmatpush1.bf16.xpose.msra.mxu1 %v1828_v13 }
 0x3c2   : > { %2076 = vpow2.f32 %v1329_v9 }
 0x3c3   : > { %v2071_v62 = vpop.eup %2070  ;;  %2078 = vrcp.f32 %v1362_v58 }
 0x3c4   : > { %v1146_v11 = vpop.xlane.xlu0 %1145  ;;  %v1452_v42 = vmul.f32 %v2071_v62, %v2760_v1  ;;  %v1451_v33 = vmul.f32 %v2071_v62, %v2758_v20  ;;  %v1365_v30 = vpop.xlane.xlu1 %1364 }
 0x3c5   : > { %v1209_v55 = vsub.f32 %v2690_v60, %v1146_v11  ;;  %v1210_v15 = vsub.f32 %v2692_v57, %v1146_v11  ;;  %2080 = vrcp.f32 %v1365_v30  ;;  %v2982_v20 = vpop.f32.mrb[6].mxu0 }
 0x3c6   : > { %v1830_v2 = vpack.c.bf16 %v1452_v42, %v1449_v14  ;;  %v1832_v7 = vpack.c.bf16 %v1451_v33, %v1448_v51  ;;  %v2986_v57 = vpop.f32.mrb[7].mxu0 }
 0x3c7   : > { %v1335_v63 = vmul.f32 1.442695, %v1209_v55  ;;  %v1337_v43 = vmul.f32 1.442695, %v1210_v15  ;;  %v2073_v24 = vpop.eup %2072  ;;  %v2990_v5 = vpop.f32.mrb[8].mxu0 }
 0x3c8   : > { %1831 = vmatprep.subr.bf16.mxu1 %v1830_v2  ;;  %v1368_v12 = vpop.xlane.xlu0 %1367  ;;  %v2994_v21 = vpop.f32.mrb[9].mxu0  ;;  %v1455_v9 = vmul.f32 %v2073_v24, %v2768_v4  ;;  %v1454_v62 = vmul.f32 %v2073_v24, %v2766_v23 }
 0x3c9   : > { %2082 = vpow2.f32 %v1335_v63  ;;  %1833 = vmatpush1.bf16.xpose.msra.mxu1 %v1832_v7  ;;  %v3003_v33 = vpop.f32.mrb[10].mxu0 }
 0x3ca   : > { %2084 = vpow2.f32 %v1337_v43  ;;  %v3005_v4 = vpop.f32.mrb[11].mxu0 }
 0x3cb   : > { %v2984_v60 = vpop.eup %2074  ;;  %2086 = vrcp.f32 %v1368_v12 }
 0x3cc   : > { %v2988_v1 = vpop.eup %2076  ;;  %v1371_v49 = vpop.xlane.xlu1 %1370 }
 0x3cd   : > { %v2079_v52 = vpop.eup %2078  ;;  %517 = vperm.xlu1 %1939, %v503_v17   ;;  %v1426_v13 = vadd.f32 %v2988_v1, %v2984_v60  ;;  %2088 = vrcp.f32 %v1371_v49 }
 0x3ce   : > { %v1458_v58 = vmul.f32 %v2079_v52, %v2779_v54  ;;  %v1457_v11 = vmul.f32 %v2079_v52, %v2774_v26 }
 0x3cf   : > { %1427 = vadd.xlane.f32.xlu0 %v1426_v13  ;;  %v2081_v54 = vpop.eup %2080 }
 0x3d0   : > { %v1374_v14 = vpop.xlane.xlu0 %1373  ;;  %v1834_v42 = vpack.c.bf16 %v1458_v58, %v1455_v9  ;;  %v1836_v51 = vpack.c.bf16 %v1457_v11, %v1454_v62  ;;  %v1461_v2 = vmul.f32 %v2081_v54, %v2787_v0  ;;  %v1460_v63 = vmul.f32 %v2081_v54, %v2785_v6 }
 0x3d1   : > { %2090 = vrcp.f32 %v1374_v14  ;;  %522 = vperm.xlu1 %1939, %v504_v45  }
 0x3d2   : > { %1835 = vmatprep.subr.bf16.mxu1 %v1834_v42 }
 0x3d3   : > { %v3007_v55 = vpop.eup %2082  ;;  %1837 = vmatpush1.bf16.xpose.msra.mxu1 %v1836_v51 }
 0x3d4   : > { %v3009_v15 = vpop.eup %2084  ;;  %v1377_v23 = vpop.xlane.xlu1 %1376 }
 0x3d5   : > { %v2087_v26 = vpop.eup %2086  ;;  %v1432_v30 = vadd.f32 %v3009_v15, %v3007_v55  ;;  %2092 = vrcp.f32 %v1377_v23 }
 0x3d6   : > { %v1464_v7 = vmul.f32 %v2087_v26, %v2798_v16  ;;  %v1463_v43 = vmul.f32 %v2087_v26, %v2793_v32  ;;  %v502_v26 = vld [vmem:[%s3149_s6 + $0x8] sm:$0xff] }
 0x3d7   : > { %1433 = vadd.xlane.f32.xlu0 %v1432_v30  ;;  %v2089_v49 = vpop.eup %2088 }
 0x3d8   : > { %v1380_v12 = vpop.xlane.xlu0 %1379  ;;  %v1838_v24 = vpack.c.bf16 %v1464_v7, %v1461_v2  ;;  %v1840_v17 = vpack.c.bf16 %v1463_v43, %v1460_v63  ;;  %v1467_v9 = vmul.f32 %v2089_v49, %v2806_v28  ;;  %v1466_v6 = vmul.f32 %v2089_v49, %v2804_v27  ;;  %v1790_v7 = vld [vmem:[#allocation2] ss:$0 sm:$0xff] }
 0x3d9   : > { %2094 = vrcp.f32 %v1380_v12 }
 0x3da   : > { %1839 = vmatprep.subr.bf16.mxu1 %v1838_v24 }
 0x3db   : > { %v2091_v52 = vpop.eup %2090  ;;  %1841 = vmatpush1.bf16.xpose.msra.mxu1 %v1840_v17 }
 0x3dc   : > { %v1383_v13 = vpop.xlane.xlu1 %1382  ;;  %v1470_v0 = vmul.f32 %v2091_v52, %v2814_v22  ;;  %v1469_v16 = vmul.f32 %v2091_v52, %v2812_v38 }
 0x3dd   : > { %2096 = vrcp.f32 %v1383_v13 }
 0x3de   : > { %v1842_v32 = vpack.c.bf16 %v1470_v0, %v1467_v9  ;;  %v1844_v58 = vpack.c.bf16 %v1469_v16, %v1466_v6 }
 0x3df   : > { %v2093_v62 = vpop.eup %2092 }
 0x3e0   : > { %v1386_v45 = vpop.xlane.xlu0 %1385  ;;  %1843 = vmatprep.subr.bf16.mxu1 %v1842_v32  ;;  %v1473_v42 = vmul.f32 %v2093_v62, %v2822_v25  ;;  %v1472_v38 = vmul.f32 %v2093_v62, %v2820_v41 }
 0x3e1   : > { %2098 = vrcp.f32 %v1386_v45 }
 0x3e3   : > { %v2095_v11 = vpop.eup %2094  ;;  %1845 = vmatpush1.bf16.xpose.msra.mxu1 %v1844_v58 }
 0x3e4   : > { %v1389_v14 = vpop.xlane.xlu1 %1388  ;;  %v1476_v28 = vmul.f32 %v2095_v11, %v2830_v29  ;;  %v1475_v22 = vmul.f32 %v2095_v11, %v2828_v44 }
 0x3e5   : > { %2100 = vrcp.f32 %v1389_v14 }
 0x3e6   : > { %v1846_v51 = vpack.c.bf16 %v1476_v28, %v1473_v42  ;;  %v1848_v27 = vpack.c.bf16 %v1475_v22, %v1472_v38  ;;  %v3229_v28 = vld [vmem:[#allocation10_spill] sm:$0xff]  ;;  %v3230_v22 = vld [vmem:[#allocation9_spill] sm:$0xff] }
 0x3e7   : > { %v2097_v23 = vpop.eup %2096 }
 0x3e8   : > { %v1392_v54 = vpop.xlane.xlu0 %1391  ;;  %1847 = vmatprep.subr.bf16.mxu1 %v1846_v51  ;;  %v1479_v29 = vmul.f32 %v2097_v23, %v2838_v36  ;;  %v1478_v2 = vmul.f32 %v2097_v23, %v2836_v47 }
 0x3e9   : > { %2102 = vrcp.f32 %v1392_v54 }
 0x3eb   : > { %v2099_v30 = vpop.eup %2098  ;;  %1849 = vmatpush1.bf16.xpose.msra.mxu1 %v1848_v27 }
 0x3ec   : > { %v1395_v25 = vpop.xlane.xlu1 %1394  ;;  %v1482_v44 = vmul.f32 %v2099_v30, %v2846_v34  ;;  %v1481_v41 = vmul.f32 %v2099_v30, %v2844_v50 }
 0x3ed   : > { %512 = vperm.xlu0 %1938, %v502_v26   ;;  %2104 = vrcp.f32 %v1395_v25  ;;  %v3231_v26 = vld [vmem:[#allocation12_spill] sm:$0xff]  ;;  %v3232_v25 = vld [vmem:[#allocation11_spill] sm:$0xff] }
 0x3ee   : > { %v1850_v63 = vpack.c.bf16 %v1482_v44, %v1479_v29  ;;  %v1852_v43 = vpack.c.bf16 %v1481_v41, %v1478_v2 }
 0x3ef   : > { %v2101_v24 = vpop.eup %2100 }
 0x3f0   : > { %v1398_v12 = vpop.xlane.xlu0 %1397  ;;  %1851 = vmatprep.subr.bf16.mxu1 %v1850_v63  ;;  %v1485_v36 = vmul.f32 %v2101_v24, %v2854_v19  ;;  %v1484_v47 = vmul.f32 %v2101_v24, %v2852_v53  ;;  %v3233_v24 = vld [vmem:[#allocation15_spill] sm:$0xff] }
 0x3f1   : > { %1627 = vperm.xlu0 %1938, %v1790_v7   ;;  %2106 = vrcp.f32 %v1398_v12 }
 0x3f3   : > { %v2103_v17 = vpop.eup %2102  ;;  %1853 = vmatpush1.bf16.xpose.msra.mxu1 %v1852_v43 }
 0x3f4   : > { %v1401_v49 = vpop.xlane.xlu1 %1400  ;;  %v1488_v34 = vmul.f32 %v2103_v17, %v2862_v31  ;;  %v1487_v50 = vmul.f32 %v2103_v17, %v2860_v56 }
 0x3f5   : > { %2108 = vrcp.f32 %v1401_v49  ;;  %v3234_v49 = vld [vmem:[#allocation14_spill] sm:$0xff] }
 0x3f6   : > { %v1854_v52 = vpack.c.bf16 %v1488_v34, %v1485_v36  ;;  %v1856_v13 = vpack.c.bf16 %v1487_v50, %v1484_v47  ;;  %v3235_v36 = vld [vmem:[#allocation13_spill] sm:$0xff] }
 0x3f7   : > { %v2105_v0 = vpop.eup %2104 }
 0x3f8   : > { %v1404_v9 = vpop.xlane.xlu0 %1403  ;;  %1855 = vmatprep.subr.bf16.mxu1 %v1854_v52  ;;  %v1491_v32 = vmul.f32 %v2105_v0, %v2870_v35  ;;  %v1490_v56 = vmul.f32 %v2105_v0, %v2868_v59 }
 0x3f9   : > { %2110 = vrcp.f32 %v1404_v9  ;;  %v3236_v9 = vld [vmem:[#allocation20_spill] sm:$0xff] }
 0x3fb   : > { %v2107_v16 = vpop.eup %2106  ;;  %1857 = vmatpush1.bf16.xpose.msra.mxu1 %v1856_v13 }
 0x3fc   : > { %v1407_v6 = vpop.xlane.xlu1 %1406  ;;  %v1494_v19 = vmul.f32 %v2107_v16, %v2878_v61  ;;  %v1493_v31 = vmul.f32 %v2107_v16, %v2876_v3 }
 0x3fd   : > { %2112 = vrcp.f32 %v1407_v6  ;;  %v3237_v6 = vld [vmem:[#allocation17_spill] sm:$0xff] }
 0x3fe   : > { %v1858_v58 = vpack.c.bf16 %v1494_v19, %v1491_v32  ;;  %v1860_v53 = vpack.c.bf16 %v1493_v31, %v1490_v56  ;;  %v3238_v32 = vld [vmem:[#allocation19_spill] sm:$0xff]  ;;  %v3239_v31 = vld [vmem:[#allocation18_spill] sm:$0xff] }
 0x3ff   : > { %v2109_v62 = vpop.eup %2108 }
 0x400   : > { %v1410_v45 = vpop.xlane.xlu0 %1409  ;;  %1859 = vmatprep.subr.bf16.mxu1 %v1858_v58  ;;  %v1497_v42 = vmul.f32 %v2109_v62, %v2886_v40  ;;  %v1496_v3 = vmul.f32 %v2109_v62, %v3230_v22  ;;  %v3240_v58 = vld [vmem:[#allocation16_spill] sm:$0xff] }
 0x401   : > { %2114 = vrcp.f32 %v1410_v45 }
 0x403   : > { %v2111_v11 = vpop.eup %2110  ;;  %1861 = vmatpush1.bf16.xpose.msra.mxu1 %v1860_v53 }
 0x404   : > { %v1413_v14 = vpop.xlane.xlu1 %1412  ;;  %v1500_v35 = vmul.f32 %v2111_v11, %v2894_v48  ;;  %v1499_v61 = vmul.f32 %v2111_v11, %v3229_v28  ;;  %v3241_v28 = vld [vmem:[#allocation23_spill] sm:$0xff] }
 0x405   : > { %2116 = vrcp.f32 %v1413_v14 }
 0x406   : > { %v1862_v38 = vpack.c.bf16 %v1500_v35, %v1497_v42  ;;  %v1864_v59 = vpack.c.bf16 %v1499_v61, %v1496_v3  ;;  %v3242_v3 = vld [vmem:[#allocation22_spill] sm:$0xff] }
 0x407   : > { %v2113_v27 = vpop.eup %2112 }
 0x408   : > { %v1416_v51 = vpop.xlane.xlu0 %1415  ;;  %1863 = vmatprep.subr.bf16.mxu1 %v1862_v38  ;;  %v1503_v30 = vmul.f32 %v2113_v27, %v3231_v26  ;;  %v1502_v29 = vmul.f32 %v2113_v27, %v3232_v25 }
 0x409   : > { %2118 = vrcp.f32 %v1416_v51 }
 0x40b   : > { %v2115_v54 = vpop.eup %2114  ;;  %1865 = vmatpush1.bf16.xpose.msra.mxu1 %v1864_v59 }
 0x40c   : > { %v1419_v23 = vpop.xlane.xlu1 %1418  ;;  %v1506_v40 = vmul.f32 %v2115_v54, %v2910_v46  ;;  %v1505_v48 = vmul.f32 %v2115_v54, %v2908_v37 }
 0x40d   : > { %2120 = vrcp.f32 %v1419_v23 }
 0x40e   : > { %v1866_v44 = vpack.c.bf16 %v1506_v40, %v1503_v30  ;;  %v1868_v41 = vpack.c.bf16 %v1505_v48, %v1502_v29 }
 0x40f   : > { %v2117_v7 = vpop.eup %2116 }
 0x410   : > { %v1422_v2 = vpop.xlane.xlu0 %1421  ;;  %1867 = vmatprep.subr.bf16.mxu1 %v1866_v44  ;;  %v1509_v12 = vmul.f32 %v2117_v7, %v2918_v8  ;;  %v1508_v37 = vmul.f32 %v2117_v7, %v3235_v36 }
 0x411   : > { %2122 = vrcp.f32 %v1422_v2 }
 0x413   : > { %v2119_v63 = vpop.eup %2118  ;;  %1869 = vmatpush1.bf16.xpose.msra.mxu1 %v1868_v41 }
 0x414   : > { %v1425_v43 = vpop.xlane.xlu1 %1424  ;;  %v1512_v17 = vmul.f32 %v2119_v63, %v3233_v24  ;;  %v1511_v46 = vmul.f32 %v2119_v63, %v3234_v49  ;;  %v2133_v24 = vld [vmem:[%s2404_s20 + $0x8] sm:$0xff] }
 0x415   : > { %2124 = vrcp.f32 %v1425_v43  ;;  %v2132_v43 = vld [vmem:[%s2404_s20] sm:$0xff] }
 0x416   : > { %v1870_v34 = vpack.c.bf16 %v1512_v17, %v1509_v12  ;;  %v1872_v50 = vpack.c.bf16 %v1511_v46, %v1508_v37  ;;  %v2134_v46 = vld [vmem:[%s2404_s20 + $0x10] sm:$0xff]  ;;  %v2135_v37 = vld [vmem:[%s2404_s20 + $0x18] sm:$0xff] }
 0x417   : > { %v2121_v52 = vpop.eup %2120 }
 0x418   : > { %1871 = vmatprep.subr.bf16.mxu1 %v1870_v34  ;;  %v508_v47 = vpop.permute.xlu1 %507  ;;  %v1515_v8 = vmul.f32 %v2121_v52, %v3237_v6  ;;  %v1514_v53 = vmul.f32 %v2121_v52, %v3240_v58 }
 0x419   : > { %v604_v13 = vadd.f32 %v2953_v10, %v508_v47  ;;  %v606_v0 = vadd.f32 %v3236_v9, %v508_v47  ;;  %v2136_v9 = vld [vmem:[%s2404_s20 + $0x20] sm:$0xff] }
 0x41b   : > { %v2123_v16 = vpop.eup %2122  ;;  %1873 = vmatpush1.bf16.xpose.msra.mxu1 %v1872_v50  ;;  %1595 = vmatprep.mubr.f32.mxu1 %v606_v0 }
 0x41c   : > { %v1518_v19 = vmul.f32 %v2123_v16, %v3238_v32  ;;  %v1517_v56 = vmul.f32 %v2123_v16, %v3239_v31  ;;  %v2137_v16 = vld [vmem:[%s2404_s20 + $0x28] sm:$0xff] }
 0x41e   : > { %v1874_v45 = vpack.c.bf16 %v1518_v19, %v1515_v8  ;;  %v1876_v62 = vpack.c.bf16 %v1517_v56, %v1514_v53  ;;  %v2138_v56 = vld [vmem:[%s2404_s20 + $0x30] sm:$0xff]  ;;  %v2139_v53 = vld [vmem:[%s2404_s20 + $0x38] sm:$0xff] }
 0x41f   : > { %v2125_v42 = vpop.eup %2124 }
 0x420   : > { %1875 = vmatprep.subr.bf16.mxu1 %v1874_v45  ;;  %v1521_v61 = vmul.f32 %v2125_v42, %v3241_v28  ;;  %v1520_v38 = vmul.f32 %v2125_v42, %v3242_v3 }
 0x423   : > { %1877 = vmatpush1.bf16.xpose.msra.mxu1 %v1876_v62 }
 0x449   : > { %v1431_v10 = vpop.xlane.xlu1 %1430 }
 0x45c   : > { %v1428_v11 = vpop.xlane.xlu0 %1427 }
 0x45d   : > { %2126 = vrcp.f32 %v1428_v11 }
 0x45e   : > { %2128 = vrcp.f32 %v1431_v10 }
 0x464   : > { %v1434_v14 = vpop.xlane.xlu0 %1433 }
 0x465   : > { %2130 = vrcp.f32 %v1434_v14 }
 0x467   : > { %v2127_v35 = vpop.eup %2126 }
 0x468   : > { %v1524_v22 = vmul.f32 %v2127_v35, %v2988_v1  ;;  %v1523_v59 = vmul.f32 %v2127_v35, %v2984_v60  ;;  %v2129_v54 = vpop.eup %2128  ;;  %v518_v60 = vpop.permute.xlu1 %517 }
 0x469   : > { %v1527_v26 = vmul.f32 %v2129_v54, %v2963_v18  ;;  %v1526_v40 = vmul.f32 %v2129_v54, %v2961_v39  ;;  %v618_v18 = vadd.f32 %v2994_v21, %v518_v60  ;;  %v616_v39 = vadd.f32 %v2990_v5, %v518_v60 }
 0x46a   : > { %v1878_v51 = vpack.c.bf16 %v1524_v22, %v1521_v61  ;;  %v1880_v27 = vpack.c.bf16 %v1523_v59, %v1520_v38 }
 0x46c   : > { %1879 = vmatprep.subr.bf16.mxu1 %v1878_v51  ;;  %v513_v29 = vpop.permute.xlu0 %512 }
 0x46d   : > { %1881 = vmatpush1.bf16.xpose.msra.mxu1 %v1880_v27  ;;  %v612_v44 = vadd.f32 %v2986_v57, %v513_v29  ;;  %v610_v41 = vadd.f32 %v2982_v20, %v513_v29 }
 0x46f   : > { %v2131_v23 = vpop.eup %2130 }
 0x470   : > { %v1530_v30 = vmul.f32 %v2131_v23, %v3009_v15  ;;  %v1529_v48 = vmul.f32 %v2131_v23, %v3007_v55  ;;  %v523_v15 = vpop.permute.xlu1 %522  ;;  %v1628_v2 = vpop.permute.xlu0 %1627 }
 0x471   : > { %v624_v55 = vadd.f32 %v3005_v4, %v523_v15  ;;  %v622_v57 = vadd.f32 %v3003_v33, %v523_v15 }
 0x472   : > { %v1882_v25 = vpack.c.bf16 %v1530_v30, %v1527_v26  ;;  %v1884_v1 = vpack.c.bf16 %v1529_v48, %v1526_v40 }
 0x474   : > { %1883 = vmatprep.subr.bf16.mxu1 %v1882_v25 }
 0x475   : > { %1885 = vmatpush1.bf16.xpose.msra.mxu1 %v1884_v1 }
 0x47c   : > { %1596 = vmatmul.mubr.f32.vlgmr.msra.gmra.mrb[64].mxu1 %v604_v13 }
 0x47d   : > { %1601 = vmatprep.mubr.f32.mxu1 %v612_v44 }
 0x480   : > { %1602 = vmatmul.mubr.f32.gmra.mrb[66].mxu1 %v610_v41 }
 0x481   : > { %1607 = vmatprep.mubr.f32.mxu1 %v618_v18 }
 0x484   : > { %1608 = vmatmul.mubr.f32.gmra.mrb[68].mxu1 %v616_v39 }
 0x485   : > { %1613 = vmatprep.mubr.f32.mxu1 %v624_v55 }
 0x488   : > { %1614 = vmatmul.mubr.f32.gmra.mrb[70].mxu1 %v622_v57 }
 0x54f   : > { %v1597_v20 = vpop.f32.mrb[64].mxu1 }
 0x550   : > { %v1630_v7 = vmul.f32 %v1628_v2, %v1597_v20  ;;  %v1599_v21 = vpop.f32.mrb[65].mxu1 }
 0x551   : > { %v1631_v63 = vmul.f32 %v1628_v2, %v1599_v21 }
 0x552   : > { %v1638_v12 = vadd.f32 %v2132_v43, %v1630_v7 }
 0x553   : > { %v1639_v17 = vadd.f32 %v2133_v24, %v1631_v63  ;;  %v1603_v5 = vpop.f32.mrb[66].mxu1 }
 0x554   : > { %1646 = vst [vmem:[%s3076_s27] sm:$0xff] %v1638_v12  ;;  %v1632_v33 = vmul.f32 %v1628_v2, %v1603_v5  ;;  %v1605_v4 = vpop.f32.mrb[67].mxu1 }
 0x555   : > { %1647 = vst [vmem:[%s3076_s27 + $0x8] sm:$0xff] %v1639_v17  ;;  %v1633_v49 = vmul.f32 %v1628_v2, %v1605_v4 }
 0x556   : > { %v1640_v36 = vadd.f32 %v2134_v46, %v1632_v33 }
 0x557   : > { %v1641_v34 = vadd.f32 %v2135_v37, %v1633_v49  ;;  %v1609_v50 = vpop.f32.mrb[68].mxu1 }
 0x558   : > { %1648 = vst [vmem:[%s3076_s27 + $0x10] sm:$0xff] %v1640_v36  ;;  %v1634_v47 = vmul.f32 %v1628_v2, %v1609_v50  ;;  %v1611_v52 = vpop.f32.mrb[69].mxu1 }
 0x559   : > { %1649 = vst [vmem:[%s3076_s27 + $0x18] sm:$0xff] %v1641_v34  ;;  %v1635_v13 = vmul.f32 %v1628_v2, %v1611_v52 }
 0x55a   : > { %v1642_v0 = vadd.f32 %v2136_v9, %v1634_v47 }
 0x55b   : > { %v1643_v6 = vadd.f32 %v2137_v16, %v1635_v13  ;;  %v1615_v8 = vpop.f32.mrb[70].mxu1 }
 0x55c   : > { %1650 = vst [vmem:[%s3076_s27 + $0x20] sm:$0xff] %v1642_v0  ;;  %v1636_v32 = vmul.f32 %v1628_v2, %v1615_v8  ;;  %v1617_v19 = vpop.f32.mrb[71].mxu1 }
 0x55d   : > { %1651 = vst [vmem:[%s3076_s27 + $0x28] sm:$0xff] %v1643_v6  ;;  %v1637_v31 = vmul.f32 %v1628_v2, %v1617_v19 }
 0x55e   : > { %v1644_v58 = vadd.f32 %v2138_v56, %v1636_v32 }
 0x55f   : > { %v1645_v45 = vadd.f32 %v2139_v53, %v1637_v31 }
 0x560   : > { %1652 = vst [vmem:[%s3076_s27 + $0x30] sm:$0xff] %v1644_v58 }
 0x561   : > { %1653 = vst [vmem:[%s3076_s27 + $0x38] sm:$0xff] %v1645_v45 }
 0x562   : > { %2183 = shalt.err (!%p2180_p2)
}
 0x563   : > { %s2184_s20 = scalar_lea.hbm %s3096_s26, 1024  ;;  %s2188_s27 = scalar_lea.hbm %s3151_s8, 2048 }
 0x564   : > { %p2185_p4 = scmp.ne.s32.totalorder %s3096_s26, %s2184_s20  ;;  %p2189_p9 = scmp.lt.u32.totalorder %s3096_s26, %s3151_s8 }
 0x565   : > { %p2190_p1 = scmp.lt.u32.totalorder %s2188_s27, %s2184_s20  ;;  %p2192_p6 = scmp.lt.u32.totalorder %s2184_s20, %s3096_s26 }
 0x566   : > { %p2186_p5 = pnand %p2185_p4, %p3243_p11 }
 0x567   : > { %p2191_p3 = por %p2190_p1, %p2189_p9 }
 0x568   : > { %p2187_p7 = pneg %p2186_p5 }
 0x569   : > { %p2193_p12 = por %p2192_p6, %p2191_p3 }
 0x56b   : > { %p2194_p13 = pnand %p2193_p12, %p2187_p7 }
 0x56d   : > { %2197 = shalt.err (!%p2194_p13)
}
 0x56e   : > { %s2244_s24 = smov 256   ;;  %s2245_s14 = smov 16  }
 0x56f   : > { %1888 = dma.vmem_to_hbm [thread:$0]  (%p3243_p11), %s3089_s22, 1024, %s3096_s26, %s1655_s7, %s2244_s24, %s2244_s24, %s2245_s14  }
 0x570 PF: > { %s1683_s13 = sand.u32 1, %s2224_s29   ;;  %p3244_p8 = scmp.ne.s32.totalorder %s3184_s19, 0 }
 0x571   : > { %p3245_p10 = scmp.ge.s32.totalorder %s2236_s10, 2  ;;  %s1684_s16 = scalar_lea.sflag [#allocation5], %s1683_s13 }
 0x573   : > { %p1895_p0 = pnand %p3245_p10, %p3244_p8 }
 0x575   : > { %2219 = dma.done.wait (!%p1895_p0), %s1684_s16, 1024  }
 0x576   : > { %2221 = vsyncadd (!%p1895_p0), %s1684_s16, 4294966272  ;;  %p23_p2 = scmp.ge.s32.totalorder %s2319_s12, 4   ;;  %s3246_s29 = smov %s2228_s30 }
 0x577   : > { %s3247_s30 = smov %s2232_s9  ;;  %s3248_s9 = smov %s2331_s15 }
 0x578   : > { %s3249_s10 = smov %s2319_s12  ;;  %25 = sbr.rel (!%p23_p2) target bundleno = 8 (0x8), region = 97 }
 0x57f   :  { %1689 = vsyncpa [#allocation4], 1 }
 0x580   :  { %1691 = vsyncpa [#allocation4 + $0x1], 1 }
 0x581   :  { %1692 = vsyncpa [#allocation5], 1 }
 0x582   :  { %1694 = vsyncpa [#allocation5 + $0x1], 1 }

</bundles_post_ra>
